<compile_context>
chip_gen: v6e
topology: v6e:2x2x1
jax: 0.10.0
libtpu: 0.0.40
codegen_flags: <defaults>
</compile_context>

<pallas_src>
import functools

import jax
import jax.numpy as jnp
from jax.experimental import pallas as pl
from jax.experimental.pallas import tpu as pltpu


def _round_up(v: int, m: int) -> int:
    return -(-v // m) * m


def _agg_kernel(x_ref, idx_ref, w13_ref, b13_ref, w2t_ref, b2_ref,
                o_ref, m_ref, l_ref, acc_ref, *,
                num_nodes: int, num_groups_padded: int, hidden_padded: int,
                tile_n: int, compute_dtype):
    i = pl.program_id(0)
    neg = jnp.float32(-1e30)

    @pl.when(i == 0)
    def _init():
        m_ref[...] = jnp.full_like(m_ref, neg)      # running per-group max      [1, B]
        l_ref[...] = jnp.zeros_like(l_ref)          # running per-group exp-sum  [B, 1]
        acc_ref[...] = jnp.zeros_like(acc_ref)      # running weighted sum       [B, O]

    # ---- fused gate-layer-1 / transform matmul over this node tile (one MXU pass) ----
    x = x_ref[...].astype(compute_dtype)                               # [T, C]
    h = jnp.dot(x, w13_ref[...], preferred_element_type=jnp.float32)   # [T, H+O] f32
    h = jnp.maximum(h + b13_ref[...], 0.0)                             # bias + ReLU
    h1 = h[:, :hidden_padded]                                          # [T, H]  (lane-aligned)
    t = h[:, hidden_padded:]                                           # [T, O]  (lane-aligned)

    # gate layer 2 ([H,1] matmul) as VPU broadcast-mul + lane reduction -> [T, 1] f32
    gate = jnp.sum(h1 * w2t_ref[...], axis=1, keepdims=True) + b2_ref[...]

    # ---- group-membership mask: built once, reused everywhere ----
    idx = idx_ref[...]                                                       # [T, 1] int32
    rows = jax.lax.broadcasted_iota(jnp.int32, (tile_n, 1), 0) + i * tile_n
    valid = rows < num_nodes                                                 # [T, 1] bool
    groups = jax.lax.broadcasted_iota(jnp.int32, (tile_n, num_groups_padded), 1)
    in_grp = jnp.logical_and(idx == groups, valid)                           # [T, B] bool
    onehot = in_grp.astype(jnp.float32)                                      # single cast

    # ---- online (streaming) segment softmax update, all stats in f32 ----
    masked = jnp.where(in_grp, gate, neg)                     # [T, B] (select, padded rows -> neg)
    tile_max = jnp.max(masked, axis=0, keepdims=True)         # [1, B]
    m_old = m_ref[...]
    m_new = jnp.maximum(m_old, tile_max)                      # [1, B]
    corr_row = jnp.exp(m_old - m_new)                         # [1, B] rescale of old stats
    corr_col = corr_row.T                                     # [B, 1] (single tiny transpose/tile)

    node_m = jnp.sum(onehot * m_new, axis=1, keepdims=True)   # [T, 1] per-node max (lane reduce)
    e = jnp.exp(jnp.where(valid, gate - node_m, neg))         # [T, 1]; padded rows -> exactly 0
    et = jnp.where(valid, e * t, 0.0)                         # [T, O]; select kills garbage rows

    # One MXU matmul for both the weighted sum and the exp-sum: onehot^T @ [et | e].
    # Transposed-LHS contraction -> no materialized onehot.T.  Kept in f32.
    rhs = jnp.concatenate([et, e], axis=1)                    # [T, O+1]
    contrib = jax.lax.dot_general(
        onehot, rhs,
        dimension_numbers=(((0,), (0,)), ((), ())),
        preferred_element_type=jnp.float32)                   # [B, O+1]

    acc_ref[...] = acc_ref[...] * corr_col + contrib[:, :-1]
    l_ref[...] = l_ref[...] * corr_col + contrib[:, -1:]
    m_ref[...] = m_new

    @pl.when(i == pl.num_programs(0) - 1)
    def _finalize():
        denom = l_ref[...] + 1e-16                            # [B, 1]
        o_ref[...] = (acc_ref[...] / denom).astype(o_ref.dtype)


def attentional_graph_aggregation(x, index, params, dim_size, *,
                                  tile_n: int = 1024,
                                  compute_dtype=jnp.bfloat16,
                                  vmem_budget_bytes: int = 40 * 1024 * 1024):
    """x: [N, C] float32, index: [N] int group ids. Returns [dim_size, out_channels] f32."""
    n, c = x.shape
    hidden = params["w1"].shape[1]
    out_channels = params["w3"].shape[1]

    # Lane-pad hidden / out_channels to 128 (aligned slices, full-width stores);
    # sublane-pad the group axis to 8.  Padding is zero weights/bias -> exact math.
    h_pad = _round_up(hidden, 128)
    o_pad = _round_up(out_channels, 128)
    b_pad = _round_up(dim_size, 8)

    w1 = jnp.pad(params["w1"], ((0, 0), (0, h_pad - hidden)))
    w3 = jnp.pad(params["w3"], ((0, 0), (0, o_pad - out_channels)))
    w13 = jnp.concatenate([w1, w3], axis=1).astype(compute_dtype)        # [C, H+O]
    b1 = jnp.pad(params["b1"], ((0, 0), (0, h_pad - hidden)))
    b3 = jnp.pad(params["b3"], ((0, 0), (0, o_pad - out_channels)))
    b13 = jnp.concatenate([b1, b3], axis=1).astype(jnp.float32)          # [1, H+O]
    w2t = jnp.pad(params["w2"].T, ((0, 0), (0, h_pad - hidden))).astype(jnp.float32)  # [1, H]
    b2 = params["b2"].astype(jnp.float32)                                # [1, 1]

    x_c = x.astype(compute_dtype)                 # bf16 stream halves HBM traffic on v6e/v7x
    idx2d = index.reshape(n, 1).astype(jnp.int32)

    # ---- tile size: as large as fits a conservative VMEM budget (v7x: 64 MiB) ----
    itemsize = jnp.dtype(compute_dtype).itemsize
    fixed_bytes = (2 * w13.size * itemsize + 2 * b13.size * 4 + 2 * w2t.size * 4 + 16
                   + 2 * b_pad * o_pad * 4          # acc scratch + output block
                   + 2 * b_pad * 16)                # m / l scratch (padded)
    per_row_bytes = (2 * c * itemsize + 2 * 4       # x (double-buffered) + idx
                     + 2 * (h_pad + o_pad) * 4      # h + elementwise temporaries
                     + (o_pad + 1) * 4              # rhs of contrib matmul
                     + 3 * b_pad * 4)               # in_grp / onehot / masked passes
    cap = max(8, int((vmem_budget_bytes - fixed_bytes) // max(per_row_bytes, 1)))
    tile_n = max(8, min(tile_n, cap))
    tile_n = min(tile_n, n)
    if tile_n >= 8:
        tile_n = (tile_n // 8) * 8                  # round DOWN: block never exceeds N
    num_tiles = pl.cdiv(n, tile_n)

    kernel = functools.partial(
        _agg_kernel, num_nodes=n, num_groups_padded=b_pad, hidden_padded=h_pad,
        tile_n=tile_n, compute_dtype=compute_dtype)

    flops = (2 * n * c * (h_pad + o_pad)             # fused matmul
             + 2 * n * h_pad                         # gate lane reduction
             + 2 * n * b_pad * (o_pad + 1)           # onehot^T @ [et | e]
             + 8 * n * b_pad)                        # one-hot / softmax VPU work
    transcendentals = 2 * n + num_tiles * b_pad
    bytes_accessed = (x_c.size * itemsize + idx2d.size * 4
                      + w13.size * itemsize + b13.size * 4
                      + w2t.size * 4 + b2.size * 4
                      + b_pad * o_pad * 4)

    grid_spec = pltpu.PrefetchScalarGridSpec(
        num_scalar_prefetch=0,
        grid=(num_tiles,),
        in_specs=[
            # x / index stream; add pipeline_mode=pl.Buffered(3) only if xprof shows
            # exposed DMA at large tiles (costs extra VMEM, matters on v7x).
            pl.BlockSpec((tile_n, c), lambda i: (i, 0)),                 # x tile
            pl.BlockSpec((tile_n, 1), lambda i: (i, 0)),                 # index tile
            pl.BlockSpec((c, h_pad + o_pad), lambda i: (0, 0)),          # fused W (resident)
            pl.BlockSpec((1, h_pad + o_pad), lambda i: (0, 0)),          # fused bias
            pl.BlockSpec((1, h_pad), lambda i: (0, 0)),                  # gate W2^T
            pl.BlockSpec((1, 1), lambda i: (0, 0)),                      # gate b2
        ],
        out_specs=pl.BlockSpec((b_pad, o_pad), lambda i: (0, 0)),
        scratch_shapes=[
            pltpu.VMEM((1, b_pad), jnp.float32),           # running max (row layout)
            pltpu.VMEM((b_pad, 1), jnp.float32),           # running exp-sum (column layout)
            pltpu.VMEM((b_pad, o_pad), jnp.float32),       # running weighted sum
        ],
    )

    out = pl.pallas_call(
        kernel,
        out_shape=jax.ShapeDtypeStruct((b_pad, o_pad), jnp.float32),
        grid_spec=grid_spec,
        compiler_params=pltpu.CompilerParams(
            dimension_semantics=("arbitrary",),            # node axis carries the accumulators
            vmem_limit_bytes=48 * 1024 * 1024),
        cost_estimate=pl.CostEstimate(
            flops=flops, transcendentals=transcendentals,
            bytes_accessed=bytes_accessed),
    )(x_c, idx2d, w13, b13, w2t, b2)

    return out[:dim_size, :out_channels]


def init_params(key, in_channels, out_channels):
    """Deterministic init mirroring the PyTorch module's parameter shapes."""
    hid = in_channels // 2
    k1, k2, k3, k4, k5, k6 = jax.random.split(key, 6)

    def lin(kw, kb, fan_in, fan_out):
        bound = 1.0 / jnp.sqrt(jnp.float32(fan_in))
        w = jax.random.uniform(kw, (fan_in, fan_out), jnp.float32, -bound, bound)
        b = jax.random.uniform(kb, (1, fan_out), jnp.float32, -bound, bound)
        return w, b

    w1, b1 = lin(k1, k2, in_channels, hid)                 # gate_nn Linear 1
    w2, b2 = lin(k3, k4, hid, 1)                           # gate_nn Linear 2
    w3, b3 = lin(k5, k6, in_channels, out_channels)        # transform_nn Linear
    return {"w1": w1, "b1": b1, "w2": w2, "b2": b2, "w3": w3, "b3": b3}


def reference(x, index, params, dim_size):
    """Pure-JAX reference for correctness checking (f32)."""
    h1 = jnp.maximum(x @ params["w1"] + params["b1"], 0.0)
    gate = h1 @ params["w2"] + params["b2"]                      # [N, 1]
    t = jnp.maximum(x @ params["w3"] + params["b3"], 0.0)        # [N, O]
    gmax = jax.ops.segment_max(gate[:, 0], index, num_segments=dim_size)
    exp_g = jnp.exp(gate[:, 0] - gmax[index])
    denom = jax.ops.segment_sum(exp_g, index, num_segments=dim_size) + 1e-16
    alpha = (exp_g / denom[index])[:, None]
    return jax.ops.segment_sum(alpha * t, index, num_segments=dim_size)


if __name__ == "__main__":
    in_channels = 32
    out_channels = 16
    num_nodes = 200          # not a multiple of small tile sizes -> exercises masked tail
    dim_size = 4             # number of graphs / groups

    key = jax.random.PRNGKey(0)
    kx, ki, kp = jax.random.split(key, 3)
    x = jax.random.normal(kx, (num_nodes, in_channels), jnp.float32)
    index = jax.random.randint(ki, (num_nodes,), 0, dim_size, dtype=jnp.int32)  # unsorted
    params = init_params(kp, in_channels, out_channels)

    ref = reference(x, index, params, dim_size)

    # Default (large-tile) f32 path: single tile, exact-ish segment softmax.
    out_big = attentional_graph_aggregation(
        x, index, params, dim_size, compute_dtype=jnp.float32)
    out_big = jax.block_until_ready(out_big)
    assert out_big.shape == (dim_size, out_channels)
    assert jnp.allclose(out_big, ref, atol=1e-4, rtol=1e-4), "f32 (default tile) mismatch"

    # Small-tile f32 path: exercises the multi-tile online segment-softmax + tail mask.
    out_f32 = attentional_graph_aggregation(
        x, index, params, dim_size, tile_n=64, compute_dtype=jnp.float32)
    out_f32 = jax.block_until_ready(out_f32)
    assert jnp.allclose(out_f32, ref, atol=1e-4, rtol=1e-4), "f32 (tiled) kernel mismatch"

    # bf16 MXU-input path (f32 accumulation, f32 softmax & segment-sum matmul).
    out_bf16 = attentional_graph_aggregation(
        x, index, params, dim_size, tile_n=64, compute_dtype=jnp.bfloat16)
    out_bf16 = jax.block_until_ready(out_bf16)
    assert jnp.allclose(out_bf16, ref, atol=5e-2, rtol=5e-2), "bf16 kernel mismatch"

    print("KERNEL_OK")
</pallas_src>

<mosaic_0001>
module attributes {stable_mosaic.version = 11 : i64} {
  func.func @_agg_kernel(%arg0: i32, %arg1: memref<200x32xf32, #tpu.memory_space<vmem>>, %arg2: memref<200x1xi32, #tpu.memory_space<vmem>>, %arg3: memref<32x256xf32, #tpu.memory_space<vmem>>, %arg4: memref<1x256xf32, #tpu.memory_space<vmem>>, %arg5: memref<1x128xf32, #tpu.memory_space<vmem>>, %arg6: memref<1x1xf32, #tpu.memory_space<vmem>>, %arg7: memref<8x128xf32, #tpu.memory_space<vmem>>, %arg8: memref<1x8xf32, #tpu.memory_space<vmem>>, %arg9: memref<8x1xf32, #tpu.memory_space<vmem>>, %arg10: memref<8x128xf32, #tpu.memory_space<vmem>>) attributes {dimension_semantics = [#tpu.dimension_semantics<arbitrary>], iteration_bounds = array<i64: 1>, scalar_prefetch = 0 : i64, scratch_operands = 3 : i64, tpu.core_type = #tpu.core_type<tc>, window_params = [{transform_indices = @transform_0, window_bounds = array<i64: 200, 32>}, {transform_indices = @transform_1, window_bounds = array<i64: 200, 1>}, {pipeline_mode = #tpu.pipeline_mode<synchronous>, transform_indices = @transform_2, window_bounds = array<i64: 32, 256>}, {pipeline_mode = #tpu.pipeline_mode<synchronous>, transform_indices = @transform_3, window_bounds = array<i64: 1, 256>}, {pipeline_mode = #tpu.pipeline_mode<synchronous>, transform_indices = @transform_4, window_bounds = array<i64: 1, 128>}, {pipeline_mode = #tpu.pipeline_mode<synchronous>, transform_indices = @transform_5, window_bounds = array<i64: 1, 1>}, {pipeline_mode = #tpu.pipeline_mode<synchronous>, transform_indices = @transform_6, window_bounds = array<i64: 8, 128>}]} {
    %c0_i32 = arith.constant 0 : i32
    %0 = arith.cmpi eq, %arg0, %c0_i32 : i32
    %1 = arith.extui %0 : i1 to i32
    %cst = arith.constant -1.000000e+30 : f32
    %c0_i32_0 = arith.constant 0 : i32
    %2 = arith.cmpi ne, %1, %c0_i32_0 : i32
    scf.if %2 {
      %77 = vector.broadcast %cst : f32 to vector<1x8xf32>
      %c0_36 = arith.constant 0 : index
      %c0_37 = arith.constant 0 : index
      %78 = vector.load %arg8[%c0_36, %c0_37] : memref<1x8xf32, #tpu.memory_space<vmem>>, vector<1x8xf32>
      tpu.vector_store %arg8[%c0_36, %c0_37], %77 {strides = array<i32>} : memref<1x8xf32, #tpu.memory_space<vmem>>, vector<1x8xf32>,
      %cst_38 = arith.constant 0.000000e+00 : f32
      %79 = vector.broadcast %cst_38 : f32 to vector<8x1xf32>
      %c0_39 = arith.constant 0 : index
      %c0_40 = arith.constant 0 : index
      %80 = vector.load %arg9[%c0_39, %c0_40] : memref<8x1xf32, #tpu.memory_space<vmem>>, vector<8x1xf32>
      tpu.vector_store %arg9[%c0_39, %c0_40], %79 {strides = array<i32>} : memref<8x1xf32, #tpu.memory_space<vmem>>, vector<8x1xf32>,
      %cst_41 = arith.constant 0.000000e+00 : f32
      %81 = vector.broadcast %cst_41 : f32 to vector<8x128xf32>
      %c0_42 = arith.constant 0 : index
      %c0_43 = arith.constant 0 : index
      %82 = vector.load %arg10[%c0_42, %c0_43] : memref<8x128xf32, #tpu.memory_space<vmem>>, vector<8x128xf32>
      tpu.vector_store %arg10[%c0_42, %c0_43], %81 {strides = array<i32>} : memref<8x128xf32, #tpu.memory_space<vmem>>, vector<8x128xf32>,
    } else {
    }
    %c0 = arith.constant 0 : index
    %c0_1 = arith.constant 0 : index
    %3 = vector.load %arg1[%c0, %c0_1] : memref<200x32xf32, #tpu.memory_space<vmem>>, vector<200x32xf32>
    %c0_2 = arith.constant 0 : index
    %c0_3 = arith.constant 0 : index
    %4 = vector.load %arg3[%c0_2, %c0_3] : memref<32x256xf32, #tpu.memory_space<vmem>>, vector<32x256xf32>
    %cst_4 = arith.constant dense<0.000000e+00> : vector<200x256xf32>
    %5 = tpu.matmul %3, %4, %cst_4 {dimension_numbers = #tpu.dot_dimension_numbers<[1], [0], [0], [1], [0, 0, 1, 1], [], []>} : vector<200x32xf32>, vector<32x256xf32>, vector<200x256xf32> -> vector<200x256xf32>
    %c0_5 = arith.constant 0 : index
    %c0_6 = arith.constant 0 : index
    %6 = vector.load %arg4[%c0_5, %c0_6] : memref<1x256xf32, #tpu.memory_space<vmem>>, vector<1x256xf32>
    %7 = vector.broadcast %6 : vector<1x256xf32> to vector<200x256xf32>
    %8 = arith.addf %5, %7 : vector<200x256xf32>
    %cst_7 = arith.constant 0.000000e+00 : f32
    %9 = vector.broadcast %cst_7 : f32 to vector<200x256xf32>
    %10 = arith.maximumf %8, %9 : vector<200x256xf32>
    %11 = vector.extract_strided_slice %10 {offsets = [0, 0], sizes = [200, 128], strides = [1, 1]} : vector<200x256xf32> to vector<200x128xf32>
    %12 = vector.extract_strided_slice %10 {offsets = [0, 128], sizes = [200, 128], strides = [1, 1]} : vector<200x256xf32> to vector<200x128xf32>
    %c0_8 = arith.constant 0 : index
    %c0_9 = arith.constant 0 : index
    %13 = vector.load %arg5[%c0_8, %c0_9] : memref<1x128xf32, #tpu.memory_space<vmem>>, vector<1x128xf32>
    %14 = vector.broadcast %13 : vector<1x128xf32> to vector<200x128xf32>
    %15 = arith.mulf %11, %14 : vector<200x128xf32>
    %cst_10 = arith.constant dense<0.000000e+00> : vector<200xf32>
    %16 = vector.multi_reduction <add>, %15, %cst_10 [1] : vector<200x128xf32> to vector<200xf32>
    %17 = vector.shape_cast %16 : vector<200xf32> to vector<200x1xf32>
    %c0_11 = arith.constant 0 : index
    %c0_12 = arith.constant 0 : index
    %18 = vector.load %arg6[%c0_11, %c0_12] : memref<1x1xf32, #tpu.memory_space<vmem>>, vector<1x1xf32>
    %19 = vector.broadcast %18 : vector<1x1xf32> to vector<200x1xf32>
    %20 = arith.addf %17, %19 : vector<200x1xf32>
    %c0_13 = arith.constant 0 : index
    %c0_14 = arith.constant 0 : index
    %21 = vector.load %arg2[%c0_13, %c0_14] : memref<200x1xi32, #tpu.memory_space<vmem>>, vector<200x1xi32>
    %22 = tpu.iota {dimensions = array<i32: 0>} : vector<200x1xi32>
    %c200_i32 = arith.constant 200 : i32
    %23 = arith.muli %arg0, %c200_i32 : i32
    %24 = vector.broadcast %23 : i32 to vector<200x1xi32>
    %25 = arith.addi %22, %24 : vector<200x1xi32>
    %c200_i32_15 = arith.constant 200 : i32
    %26 = vector.broadcast %c200_i32_15 : i32 to vector<200x1xi32>
    %27 = arith.cmpi slt, %25, %26 : vector<200x1xi32>
    %28 = tpu.iota {dimensions = array<i32: 1>} : vector<200x8xi32>
    %29 = vector.broadcast %21 : vector<200x1xi32> to vector<200x8xi32>
    %30 = arith.cmpi eq, %29, %28 : vector<200x8xi32>
    %31 = vector.broadcast %27 : vector<200x1xi1> to vector<200x8xi1>
    %32 = arith.andi %30, %31 : vector<200x8xi1>
    %33 = arith.extui %32 : vector<200x8xi1> to vector<200x8xi32>
    %34 = arith.sitofp %33 : vector<200x8xi32> to vector<200x8xf32>
    %cst_16 = arith.constant -1.000000e+30 : f32
    %35 = vector.shape_cast %20 : vector<200x1xf32> to vector<200x1xf32>
    %36 = vector.broadcast %35 : vector<200x1xf32> to vector<200x8xf32>
    %37 = vector.broadcast %cst_16 : f32 to vector<200x8xf32>
    %38 = arith.select %32, %36, %37 : vector<200x8xi1>, vector<200x8xf32>
    %cst_17 = arith.constant dense<0xFF800000> : vector<8xf32>
    %39 = vector.multi_reduction <maximumf>, %38, %cst_17 [0] : vector<200x8xf32> to vector<8xf32>
    %40 = vector.shape_cast %39 : vector<8xf32> to vector<1x8xf32>
    %c0_18 = arith.constant 0 : index
    %c0_19 = arith.constant 0 : index
    %41 = vector.load %arg8[%c0_18, %c0_19] : memref<1x8xf32, #tpu.memory_space<vmem>>, vector<1x8xf32>
    %42 = arith.maximumf %41, %40 : vector<1x8xf32>
    %43 = arith.subf %41, %42 : vector<1x8xf32>
    %44 = math.exp %43 : vector<1x8xf32>
    %45 = tpu.transpose %44, [1, 0] : vector<1x8xf32> -> vector<8x1xf32>
    %46 = vector.broadcast %42 : vector<1x8xf32> to vector<200x8xf32>
    %47 = arith.mulf %34, %46 : vector<200x8xf32>
    %cst_20 = arith.constant dense<0.000000e+00> : vector<200xf32>
    %48 = vector.multi_reduction <add>, %47, %cst_20 [1] : vector<200x8xf32> to vector<200xf32>
    %49 = vector.shape_cast %48 : vector<200xf32> to vector<200x1xf32>
    %50 = arith.subf %20, %49 : vector<200x1xf32>
    %cst_21 = arith.constant -1.000000e+30 : f32
    %51 = vector.broadcast %cst_21 : f32 to vector<200x1xf32>
    %52 = arith.select %27, %50, %51 : vector<200x1xi1>, vector<200x1xf32>
    %53 = math.exp %52 : vector<200x1xf32>
    %54 = vector.broadcast %53 : vector<200x1xf32> to vector<200x128xf32>
    %55 = arith.mulf %54, %12 : vector<200x128xf32>
    %cst_22 = arith.constant 0.000000e+00 : f32
    %56 = vector.shape_cast %27 : vector<200x1xi1> to vector<200x1xi1>
    %57 = vector.broadcast %56 : vector<200x1xi1> to vector<200x128xi1>
    %58 = vector.broadcast %cst_22 : f32 to vector<200x128xf32>
    %59 = arith.select %57, %55, %58 : vector<200x128xi1>, vector<200x128xf32>
    %60 = tpu.concatenate %59, %53 in 1 : vector<200x128xf32>, vector<200x1xf32> -> vector<200x129xf32>
    %cst_23 = arith.constant dense<0.000000e+00> : vector<8x129xf32>
    %61 = tpu.matmul %34, %60, %cst_23 {dimension_numbers = #tpu.dot_dimension_numbers<[0], [0], [1], [1], [0, 1, 1, 1], [], []>} : vector<200x8xf32>, vector<200x129xf32>, vector<8x129xf32> -> vector<8x129xf32>
    %c0_24 = arith.constant 0 : index
    %c0_25 = arith.constant 0 : index
    %62 = vector.load %arg10[%c0_24, %c0_25] : memref<8x128xf32, #tpu.memory_space<vmem>>, vector<8x128xf32>
    %63 = vector.broadcast %45 : vector<8x1xf32> to vector<8x128xf32>
    %64 = arith.mulf %62, %63 : vector<8x128xf32>
    %65 = vector.extract_strided_slice %61 {offsets = [0, 0], sizes = [8, 128], strides = [1, 1]} : vector<8x129xf32> to vector<8x128xf32>
    %66 = arith.addf %64, %65 : vector<8x128xf32>
    %c0_26 = arith.constant 0 : index
    %c0_27 = arith.constant 0 : index
    %67 = vector.load %arg10[%c0_26, %c0_27] : memref<8x128xf32, #tpu.memory_space<vmem>>, vector<8x128xf32>
    tpu.vector_store %arg10[%c0_26, %c0_27], %66 {strides = array<i32>} : memref<8x128xf32, #tpu.memory_space<vmem>>, vector<8x128xf32>,
    %c0_28 = arith.constant 0 : index
    %c0_29 = arith.constant 0 : index
    %68 = vector.load %arg9[%c0_28, %c0_29] : memref<8x1xf32, #tpu.memory_space<vmem>>, vector<8x1xf32>
    %69 = arith.mulf %68, %45 : vector<8x1xf32>
    %70 = vector.extract_strided_slice %61 {offsets = [0, 128], sizes = [8, 1], strides = [1, 1]} : vector<8x129xf32> to vector<8x1xf32>
    %71 = arith.addf %69, %70 : vector<8x1xf32>
    %c0_30 = arith.constant 0 : index
    %c0_31 = arith.constant 0 : index
    %72 = vector.load %arg9[%c0_30, %c0_31] : memref<8x1xf32, #tpu.memory_space<vmem>>, vector<8x1xf32>
    tpu.vector_store %arg9[%c0_30, %c0_31], %71 {strides = array<i32>} : memref<8x1xf32, #tpu.memory_space<vmem>>, vector<8x1xf32>,
    %c0_32 = arith.constant 0 : index
    %c0_33 = arith.constant 0 : index
    %73 = vector.load %arg8[%c0_32, %c0_33] : memref<1x8xf32, #tpu.memory_space<vmem>>, vector<1x8xf32>
    tpu.vector_store %arg8[%c0_32, %c0_33], %42 {strides = array<i32>} : memref<1x8xf32, #tpu.memory_space<vmem>>, vector<1x8xf32>,
    %c0_i32_34 = arith.constant 0 : i32
    %74 = arith.cmpi eq, %arg0, %c0_i32_34 : i32
    %75 = arith.extui %74 : i1 to i32
    %c0_i32_35 = arith.constant 0 : i32
    %76 = arith.cmpi ne, %75, %c0_i32_35 : i32
    scf.if %76 {
      %c0_36 = arith.constant 0 : index
      %c0_37 = arith.constant 0 : index
      %77 = vector.load %arg9[%c0_36, %c0_37] : memref<8x1xf32, #tpu.memory_space<vmem>>, vector<8x1xf32>
      %cst_38 = arith.constant 1.000000e-16 : f32
      %78 = vector.broadcast %cst_38 : f32 to vector<8x1xf32>
      %79 = arith.addf %77, %78 : vector<8x1xf32>
      %c0_39 = arith.constant 0 : index
      %c0_40 = arith.constant 0 : index
      %80 = vector.load %arg10[%c0_39, %c0_40] : memref<8x128xf32, #tpu.memory_space<vmem>>, vector<8x128xf32>
      %81 = vector.broadcast %79 : vector<8x1xf32> to vector<8x128xf32>
      %82 = arith.divf %80, %81 : vector<8x128xf32>
      %c0_41 = arith.constant 0 : index
      %c0_42 = arith.constant 0 : index
      %83 = vector.load %arg7[%c0_41, %c0_42] : memref<8x128xf32, #tpu.memory_space<vmem>>, vector<8x128xf32>
      tpu.vector_store %arg7[%c0_41, %c0_42], %82 {strides = array<i32>} : memref<8x128xf32, #tpu.memory_space<vmem>>, vector<8x128xf32>,
    } else {
    }
    return
  }
  func.func @transform_0(%arg0: i32) -> (i32, i32) {
    %c0_i32 = arith.constant 0 : i32
    %c0_i32_0 = arith.constant 0 : i32
    return %arg0, %c0_i32 : i32, i32
  }
  func.func @transform_1(%arg0: i32) -> (i32, i32) {
    %c0_i32 = arith.constant 0 : i32
    %c0_i32_0 = arith.constant 0 : i32
    return %arg0, %c0_i32 : i32, i32
  }
  func.func @transform_2(%arg0: i32) -> (i32, i32) {
    %c0_i32 = arith.constant 0 : i32
    %c0_i32_0 = arith.constant 0 : i32
    %c0_i32_1 = arith.constant 0 : i32
    return %c0_i32, %c0_i32_0 : i32, i32
  }
  func.func @transform_3(%arg0: i32) -> (i32, i32) {
    %c0_i32 = arith.constant 0 : i32
    %c0_i32_0 = arith.constant 0 : i32
    %c0_i32_1 = arith.constant 0 : i32
    return %c0_i32, %c0_i32_0 : i32, i32
  }
  func.func @transform_4(%arg0: i32) -> (i32, i32) {
    %c0_i32 = arith.constant 0 : i32
    %c0_i32_0 = arith.constant 0 : i32
    %c0_i32_1 = arith.constant 0 : i32
    return %c0_i32, %c0_i32_0 : i32, i32
  }
  func.func @transform_5(%arg0: i32) -> (i32, i32) {
    %c0_i32 = arith.constant 0 : i32
    %c0_i32_0 = arith.constant 0 : i32
    %c0_i32_1 = arith.constant 0 : i32
    return %c0_i32, %c0_i32_0 : i32, i32
  }
  func.func @transform_6(%arg0: i32) -> (i32, i32) {
    %c0_i32 = arith.constant 0 : i32
    %c0_i32_0 = arith.constant 0 : i32
    %c0_i32_1 = arith.constant 0 : i32
    return %c0_i32, %c0_i32_0 : i32, i32
  }
}

</mosaic_0001>

<bundles_post_ra>
// kernel: tpu_custom_call.1
= control target key start
LH: loop header
LB: loop body
LE: loop exit
PB: predicated region body
PF: predicated region fallthrough
CT: control target
= control target key end

     0   :  { %s2945_s0 = inlined_call_operand.vmem [shape: f32[200,32], index: 0, kind: input, shape index: {}]   ;;  %s2946_s1 = inlined_call_operand.vmem [shape: s32[200,1], index: 1, kind: input, shape index: {}]   ;;  %s2947_s2 = inlined_call_operand.vmem [shape: f32[32,256], index: 2, kind: input, shape index: {}]   ;;  %s2948_s3 = inlined_call_operand.vmem [shape: f32[1,256], index: 3, kind: input, shape index: {}]   ;;  %s2949_s4 = inlined_call_operand.vmem [shape: f32[1,128], index: 4, kind: input, shape index: {}]   ;;  %s2950_s5 = inlined_call_operand.<no memory space> [shape: f32[1,1], index: 5, kind: input, shape index: {}]   ;;  %s2951_s6 = inlined_call_operand.hbm [shape: f32[8,128], index: 6, kind: output, shape index: {}]  }
   0x1   :  { %v11_v0 = vstv %s2950_s5 }
   0x2   :  { %12 = vst [vmem:[#allocation5] sm:$0x1] %v11_v0 }
   0x3   :  { %v67_v1 = vld [vmem:[%s2947_s2 + $0x38] sm:$0xff]  ;;  %v66_v2 = vld [vmem:[%s2947_s2 + $0x30] sm:$0xff]  ;;  %v65_v3 = vld [vmem:[%s2947_s2 + $0x28] sm:$0xff]  ;;  %v2952_v5 = vmov 0.0   ;;  %v1808_v7 = vmov 0   ;;  %vm80_vm0 = vcmask 261120  }
   0x4   :  { %180 = vmatprep.subr.mxu0 %v67_v1  ;;  %v64_v4 = vld [vmem:[%s2947_s2 + $0x20] sm:$0xff]  ;;  %220 = vmatprep.mubr.f32.mxu0 %v2952_v5  ;;  %v63_v6 = vld [vmem:[%s2947_s2 + $0x18] sm:$0xff]  ;;  %v62_v8 = vld [vmem:[%s2947_s2 + $0x10] sm:$0xff] }
   0x5   :  { %181 = vmatpush1.msra.mxu0 %v66_v2  ;;  %1729 = vset.pattern.permute.xlu1 %v1808_v7  ;;  %v61_v9 = vld [vmem:[%s2947_s2 + $0x8] sm:$0xff]  ;;  %v60_v10 = vld [vmem:[%s2947_s2] sm:$0xff]  ;;  %v37_v16 = vld [vmem:[%s2945_s0 + $0x10] sm:$0xff] }
   0x6   :  { %182 = vmatprep.subr.mxu0 %v65_v3  ;;  %1730 = vset.pattern.permute.xlu0 %v1808_v7  ;;  %v35_v11 = vld [vmem:[%s2945_s0] sm:$0xff]  ;;  %v36_v12 = vld [vmem:[%s2945_s0 + $0x8] sm:$0xff]  ;;  %v537_v18 = vld [vmem:[%s2946_s1 + $0x10] sm:$0xff] }
   0x7   :  { %183 = vmatpush1.msra.mxu0 %v64_v4  ;;  %v535_v13 = vld [vmem:[%s2946_s1] sm:$0xff]  ;;  %v536_v14 = vld [vmem:[%s2946_s1 + $0x8] sm:$0xff]  ;;  %v38_v19 = vld [vmem:[%s2945_s0 + $0x18] sm:$0xff] }
   0x8   :  { %184 = vmatprep.subr.mxu0 %v63_v6  ;;  %641 = vperm.xlu1 %1729, %v535_v13   ;;  %v539_v15 = vld [vmem:[%s2946_s1 + $0x20] sm:$0xff]  ;;  %v544_v20 = vld [vmem:[%s2946_s1 + $0x48] sm:$0xff] }
   0x9   :  { %185 = vmatpush1.msra.mxu0 %v62_v8  ;;  %653 = vperm.xlu0 %1730, %v539_v15   ;;  %v543_v17 = vld [vmem:[%s2946_s1 + $0x40] sm:$0xff] }
   0xa   :  { %186 = vmatprep.subr.mxu0 %v61_v9 }
   0xb   :  { %187 = vmatpush1.msra.mxu0 %v60_v10 }
   0xc   :  { %1672 = vmatmul.mubr.msk.f32.vlgmr.msra.gmra.mxu0 %vm80_vm0, %v35_v11  ;;  %644 = vperm.xlu1 %1729, %v536_v14  }
   0xd   :  { %226 = vmatprep.mubr.f32.mxu0 %v2952_v5  ;;  %665 = vperm.xlu0 %1730, %v543_v17  }
  0x10   :  { %1673 = vmatmul.mubr.msk.f32.gmra.mxu0 %vm80_vm0, %v36_v12 }
  0x11   :  { %232 = vmatprep.mubr.f32.mxu0 %v2952_v5 }
  0x14   :  { %1674 = vmatmul.mubr.msk.f32.gmra.mxu0 %vm80_vm0, %v37_v16 }
  0x15   :  { %238 = vmatprep.mubr.f32.mxu0 %v2952_v5 }
  0x16   :  { %13 = vsyncpa [#allocation7], 0  ;;  %647 = vperm.xlu1 %1729, %v537_v18   ;;  %v538_v21 = vld [vmem:[%s2946_s1 + $0x18] sm:$0xff]  ;;  %v39_v22 = vld [vmem:[%s2945_s0 + $0x20] sm:$0xff]  ;;  %668 = vperm.xlu0 %1730, %v544_v20   ;;  %v2955_v59 = vlaneseq  ;;  %vm2973_vm1 = vcmask 57344   ;;  %vm1015_vm10 = vcmask 64512  }
  0x17   :  { %v546_v23 = vld [vmem:[%s2946_s1 + $0x58] sm:$0xff]  ;;  %v540_v24 = vld [vmem:[%s2946_s1 + $0x28] sm:$0xff]  ;;  %v541_v27 = vld [vmem:[%s2946_s1 + $0x30] sm:$0xff] }
  0x18   :  { %1675 = vmatmul.mubr.msk.f32.gmra.mxu0 %vm80_vm0, %v38_v19  ;;  %v40_v25 = vld [vmem:[%s2945_s0 + $0x28] sm:$0xff]  ;;  %v41_v28 = vld [vmem:[%s2945_s0 + $0x30] sm:$0xff]  ;;  %v550_v29 = vld [vmem:[%s2946_s1 + $0x78] sm:$0xff]  ;;  %v2068_v60 = vshrl.u32 %v2955_v59, 7 }
  0x19   :  { %244 = vmatprep.mubr.f32.mxu0 %v2952_v5  ;;  %v548_v26 = vld [vmem:[%s2946_s1 + $0x68] sm:$0xff]  ;;  %v542_v30 = vld [vmem:[%s2946_s1 + $0x38] sm:$0xff]  ;;  %v545_v33 = vld [vmem:[%s2946_s1 + $0x50] sm:$0xff] }
  0x1a   :  { %650 = vperm.xlu1 %1729, %v538_v21   ;;  %674 = vperm.xlu0 %1730, %v546_v23   ;;  %v42_v31 = vld [vmem:[%s2945_s0 + $0x38] sm:$0xff]  ;;  %v552_v32 = vld [vmem:[%s2946_s1 + $0x88] sm:$0xff]  ;;  %v43_v34 = vld [vmem:[%s2945_s0 + $0x40] sm:$0xff]  ;;  %v2954_v61 = vsub.s32 0, %v2068_v60  ;;  %v76_v63 = vsub.s32 1, %v2068_v60 }
  0x1b   :  { %v554_v35 = vld [vmem:[%s2946_s1 + $0x98] sm:$0xff]  ;;  %v547_v36 = vld [vmem:[%s2946_s1 + $0x60] sm:$0xff]  ;;  %v44_v37 = vld [vmem:[%s2945_s0 + $0x48] sm:$0xff] }
  0x1c   :  { %1676 = vmatmul.mubr.msk.f32.gmra.mxu0 %vm80_vm0, %v39_v22  ;;  %v556_v38 = vld [vmem:[%s2946_s1 + $0xa8] sm:$0xff]  ;;  %v549_v39 = vld [vmem:[%s2946_s1 + $0x70] sm:$0xff]  ;;  %v551_v41 = vld [vmem:[%s2946_s1 + $0x80] sm:$0xff] }
  0x1d   :  { %250 = vmatprep.mubr.f32.mxu0 %v2952_v5  ;;  %v45_v40 = vld [vmem:[%s2945_s0 + $0x50] sm:$0xff]  ;;  %v46_v42 = vld [vmem:[%s2945_s0 + $0x58] sm:$0xff]  ;;  %v47_v44 = vld [vmem:[%s2945_s0 + $0x60] sm:$0xff] }
  0x1e   :  { %656 = vperm.xlu1 %1729, %v540_v24   ;;  %680 = vperm.xlu0 %1730, %v548_v26   ;;  %v553_v43 = vld [vmem:[%s2946_s1 + $0x90] sm:$0xff]  ;;  %v555_v45 = vld [vmem:[%s2946_s1 + $0xa0] sm:$0xff]  ;;  %v48_v46 = vld [vmem:[%s2945_s0 + $0x68] sm:$0xff] }
  0x1f   :  { %v557_v47 = vld [vmem:[%s2946_s1 + $0xb0] sm:$0xff]  ;;  %v50_v49 = vld [vmem:[%s2945_s0 + $0x78] sm:$0xff]  ;;  %v51_v50 = vld [vmem:[%s2945_s0 + $0x80] sm:$0xff] }
  0x20   :  { %1677 = vmatmul.mubr.msk.f32.gmra.mxu0 %vm80_vm0, %v40_v25  ;;  %v49_v48 = vld [vmem:[%s2945_s0 + $0x70] sm:$0xff]  ;;  %v52_v51 = vld [vmem:[%s2945_s0 + $0x88] sm:$0xff]  ;;  %v54_v53 = vld [vmem:[%s2945_s0 + $0x98] sm:$0xff] }
  0x21   :  { %256 = vmatprep.mubr.f32.mxu0 %v2952_v5  ;;  %v53_v52 = vld [vmem:[%s2945_s0 + $0x90] sm:$0xff]  ;;  %v55_v54 = vld [vmem:[%s2945_s0 + $0xa0] sm:$0xff]  ;;  %v56_v55 = vld [vmem:[%s2945_s0 + $0xa8] sm:$0xff] }
  0x22   :  { %659 = vperm.xlu1 %1729, %v541_v27   ;;  %686 = vperm.xlu0 %1730, %v550_v29   ;;  %v57_v56 = vld [vmem:[%s2945_s0 + $0xb0] sm:$0xff]  ;;  %v58_v57 = vld [vmem:[%s2945_s0 + $0xb8] sm:$0xff]  ;;  %v59_v58 = vld [vmem:[%s2945_s0 + $0xc0] sm:$0xff] }
  0x23   :  { %v68_v62 = vld [vmem:[%s2948_s3] sm:$0x3] }
  0x24   :  { %1678 = vmatmul.mubr.msk.f32.gmra.mxu0 %vm80_vm0, %v41_v28  ;;  %v2077_v0 = vrot.slane %v68_v62, %v2954_v61  ;;  %v2079_v1 = vrot.slane %v68_v62, %v76_v63  ;;  %v2085_v6 = vld [vmem:[%s2949_s4] ss:$0 sm:$0xff] }
  0x25   :  { %262 = vmatprep.mubr.f32.mxu0 %v2952_v5 }
  0x26   :  { %662 = vperm.xlu1 %1729, %v542_v30   ;;  %692 = vperm.xlu0 %1730, %v552_v32   ;;  %2988 = vst [vmem:[#allocation9_spill] sm:$0xff] %v2079_v1 }
  0x28   :  { %1679 = vmatmul.mubr.msk.f32.gmra.mxu0 %vm80_vm0, %v42_v31 }
  0x29   :  { %268 = vmatprep.mubr.f32.mxu0 %v2952_v5 }
  0x2a   :  { %671 = vperm.xlu1 %1729, %v545_v33   ;;  %698 = vperm.xlu0 %1730, %v554_v35  }
  0x2c   :  { %1680 = vmatmul.mubr.msk.f32.gmra.mxu0 %vm80_vm0, %v43_v34 }
  0x2d   :  { %274 = vmatprep.mubr.f32.mxu0 %v2952_v5 }
  0x2e   :  { %677 = vperm.xlu1 %1729, %v547_v36   ;;  %704 = vperm.xlu0 %1730, %v556_v38  }
  0x30   :  { %1681 = vmatmul.mubr.msk.f32.gmra.mxu0 %vm80_vm0, %v44_v37 }
  0x31   :  { %280 = vmatprep.mubr.f32.mxu0 %v2952_v5 }
  0x32   :  { %683 = vperm.xlu1 %1729, %v549_v39  }
  0x34   :  { %1682 = vmatmul.mubr.msk.f32.gmra.mxu0 %vm80_vm0, %v45_v40 }
  0x35   :  { %286 = vmatprep.mubr.f32.mxu0 %v2952_v5 }
  0x36   :  { %689 = vperm.xlu1 %1729, %v551_v41  }
  0x38   :  { %1683 = vmatmul.mubr.msk.f32.gmra.mxu0 %vm80_vm0, %v46_v42 }
  0x39   :  { %292 = vmatprep.mubr.f32.mxu0 %v2952_v5 }
  0x3a   :  { %695 = vperm.xlu1 %1729, %v553_v43  }
  0x3c   :  { %1684 = vmatmul.mubr.msk.f32.gmra.mxu0 %vm80_vm0, %v47_v44 }
  0x3d   :  { %298 = vmatprep.mubr.f32.mxu0 %v2952_v5 }
  0x3e   :  { %701 = vperm.xlu1 %1729, %v555_v45  }
  0x40   :  { %1685 = vmatmul.mubr.msk.f32.gmra.mxu0 %vm80_vm0, %v48_v46 }
  0x41   :  { %304 = vmatprep.mubr.f32.mxu0 %v2952_v5 }
  0x42   :  { %707 = vperm.xlu1 %1729, %v557_v47  }
  0x44   :  { %1686 = vmatmul.mubr.msk.f32.gmra.mxu0 %vm80_vm0, %v49_v48 }
  0x45   :  { %310 = vmatprep.mubr.f32.mxu0 %v2952_v5 }
  0x48   :  { %1687 = vmatmul.mubr.msk.f32.gmra.mxu0 %vm80_vm0, %v50_v49 }
  0x49   :  { %316 = vmatprep.mubr.f32.mxu0 %v2952_v5 }
  0x4c   :  { %1688 = vmatmul.mubr.msk.f32.gmra.mxu0 %vm80_vm0, %v51_v50 }
  0x4d   :  { %322 = vmatprep.mubr.f32.mxu0 %v2952_v5 }
  0x50   :  { %1689 = vmatmul.mubr.msk.f32.gmra.mxu0 %vm80_vm0, %v52_v51 }
  0x51   :  { %328 = vmatprep.mubr.f32.mxu0 %v2952_v5 }
  0x54   :  { %1690 = vmatmul.mubr.msk.f32.gmra.mxu0 %vm80_vm0, %v53_v52 }
  0x55   :  { %334 = vmatprep.mubr.f32.mxu0 %v2952_v5 }
  0x58   :  { %1691 = vmatmul.mubr.msk.f32.gmra.mxu0 %vm80_vm0, %v54_v53 }
  0x59   :  { %340 = vmatprep.mubr.f32.mxu0 %v2952_v5 }
  0x5c   :  { %1692 = vmatmul.mubr.msk.f32.gmra.mxu0 %vm80_vm0, %v55_v54 }
  0x5d   :  { %346 = vmatprep.mubr.f32.mxu0 %v2952_v5 }
  0x60   :  { %1693 = vmatmul.mubr.msk.f32.gmra.mxu0 %vm80_vm0, %v56_v55 }
  0x61   :  { %352 = vmatprep.mubr.f32.mxu0 %v2952_v5 }
  0x64   :  { %1694 = vmatmul.mubr.msk.f32.gmra.mxu0 %vm80_vm0, %v57_v56 }
  0x65   :  { %358 = vmatprep.mubr.f32.mxu0 %v2952_v5 }
  0x68   :  { %1695 = vmatmul.mubr.msk.f32.gmra.mxu0 %vm80_vm0, %v58_v57 }
  0x69   :  { %364 = vmatprep.mubr.f32.mxu0 %v2952_v5 }
  0x6c   :  { %1696 = vmatmul.mubr.msk.f32.gmra.mxu0 %vm80_vm0, %v59_v58 }
  0xcc   :  { %v222_v2 = vpop.f32.mrf.mxu0 }
  0xcd   :  { %v223_v3 = vadd.f32 %v222_v2, %v2077_v0 }
  0xce   :  { %v224_v4 = vpop.f32.mrf.mxu0 }
  0xcf   :  { %v371_v7 = vmax.f32 %v223_v3, 0.0  ;;  %v2088_v8 = vadd.f32 %v224_v4, %v2079_v1 }
  0xd0   :  { %v228_v9 = vpop.f32.mrf.mxu0 }
  0xd1   :  { %2989 = vst [vmem:[#allocation10_spill] sm:$0xff] %v2088_v8  ;;  %v229_v10 = vadd.f32 %v228_v9, %v2077_v0  ;;  %v428_v11 = vmul.f32 %v2085_v6, %v371_v7 }
  0xd2   :  { %v230_v12 = vpop.f32.mrf.mxu0 }
  0xd3   :  { %v373_v13 = vmax.f32 %v229_v10, 0.0  ;;  %v2093_v14 = vadd.f32 %v230_v12, %v2079_v1  ;;  %453 = vadd.xlane.f32.xlu0 %v428_v11 }
  0xd4   :  { %v234_v15 = vpop.f32.mrf.mxu0 }
  0xd5   :  { %2990 = vst [vmem:[#allocation11_spill] sm:$0xff] %v2093_v14  ;;  %v235_v16 = vadd.f32 %v234_v15, %v2077_v0  ;;  %v429_v17 = vmul.f32 %v2085_v6, %v373_v13 }
  0xd6   :  { %v236_v18 = vpop.f32.mrf.mxu0 }
  0xd7   :  { %v375_v19 = vmax.f32 %v235_v16, 0.0  ;;  %v2098_v20 = vadd.f32 %v236_v18, %v2079_v1  ;;  %455 = vadd.xlane.f32.xlu1 %v429_v17 }
  0xd8   :  { %v240_v21 = vpop.f32.mrf.mxu0 }
  0xd9   :  { %2991 = vst [vmem:[#allocation12_spill] sm:$0xff] %v2098_v20  ;;  %v241_v22 = vadd.f32 %v240_v21, %v2077_v0  ;;  %v430_v23 = vmul.f32 %v2085_v6, %v375_v19 }
  0xda   :  { %v242_v24 = vpop.f32.mrf.mxu0 }
  0xdb   :  { %v377_v25 = vmax.f32 %v241_v22, 0.0  ;;  %v2103_v26 = vadd.f32 %v242_v24, %v2079_v1  ;;  %457 = vadd.xlane.f32.xlu1 %v430_v23 }
  0xdc   :  { %v246_v27 = vpop.f32.mrf.mxu0 }
  0xdd   :  { %2992 = vst [vmem:[#allocation13_spill] sm:$0xff] %v2103_v26  ;;  %v247_v28 = vadd.f32 %v246_v27, %v2077_v0  ;;  %v431_v29 = vmul.f32 %v2085_v6, %v377_v25 }
  0xde   :  { %v248_v30 = vpop.f32.mrf.mxu0 }
  0xdf   :  { %v379_v31 = vmax.f32 %v247_v28, 0.0  ;;  %v2108_v32 = vadd.f32 %v248_v30, %v2079_v1  ;;  %459 = vadd.xlane.f32.xlu0 %v431_v29 }
  0xe0   :  { %v252_v33 = vpop.f32.mrf.mxu0 }
  0xe1   :  { %2993 = vst [vmem:[#allocation14_spill] sm:$0xff] %v2108_v32  ;;  %v253_v34 = vadd.f32 %v252_v33, %v2077_v0  ;;  %v432_v35 = vmul.f32 %v2085_v6, %v379_v31 }
  0xe2   :  { %v254_v36 = vpop.f32.mrf.mxu0 }
  0xe3   :  { %v381_v37 = vmax.f32 %v253_v34, 0.0  ;;  %v2113_v38 = vadd.f32 %v254_v36, %v2079_v1  ;;  %461 = vadd.xlane.f32.xlu0 %v432_v35 }
  0xe4   :  { %v258_v39 = vpop.f32.mrf.mxu0 }
  0xe5   :  { %2994 = vst [vmem:[#allocation15_spill] sm:$0xff] %v2113_v38  ;;  %v259_v40 = vadd.f32 %v258_v39, %v2077_v0  ;;  %v433_v41 = vmul.f32 %v2085_v6, %v381_v37  ;;  %v1809_v38 = vmov -1e+30  }
  0xe6   :  { %v260_v42 = vpop.f32.mrf.mxu0  ;;  %31 = vst.msk [vmem:[#allocation2] sm:$0x1] %vm2973_vm1, %v1809_v38 }
  0xe7   :  { %v383_v43 = vmax.f32 %v259_v40, 0.0  ;;  %v2118_v44 = vadd.f32 %v260_v42, %v2079_v1  ;;  %463 = vadd.xlane.f32.xlu1 %v433_v41 }
  0xe8   :  { %v264_v45 = vpop.f32.mrf.mxu0 }
  0xe9   :  { %2995 = vst [vmem:[#allocation16_spill] sm:$0xff] %v2118_v44  ;;  %v265_v46 = vadd.f32 %v264_v45, %v2077_v0  ;;  %v434_v47 = vmul.f32 %v2085_v6, %v383_v43 }
  0xea   :  { %v266_v48 = vpop.f32.mrf.mxu0 }
  0xeb   :  { %v385_v49 = vmax.f32 %v265_v46, 0.0  ;;  %v2123_v50 = vadd.f32 %v266_v48, %v2079_v1  ;;  %465 = vadd.xlane.f32.xlu0 %v434_v47 }
  0xec   :  { %v270_v51 = vpop.f32.mrf.mxu0 }
  0xed   :  { %2996 = vst [vmem:[#allocation17_spill] sm:$0xff] %v2123_v50  ;;  %v271_v52 = vadd.f32 %v270_v51, %v2077_v0  ;;  %v435_v53 = vmul.f32 %v2085_v6, %v385_v49 }
  0xee   :  { %v272_v54 = vpop.f32.mrf.mxu0 }
  0xef   :  { %v387_v55 = vmax.f32 %v271_v52, 0.0  ;;  %v2128_v56 = vadd.f32 %v272_v54, %v2079_v1  ;;  %467 = vadd.xlane.f32.xlu1 %v435_v53  ;;  %v2167_v53 = vpop.permute.xlu1 %641 }
  0xf0   :  { %v276_v57 = vpop.f32.mrf.mxu0 }
  0xf1   :  { %2997 = vst [vmem:[#allocation18_spill] sm:$0xff] %v2128_v56  ;;  %v277_v58 = vadd.f32 %v276_v57, %v2077_v0  ;;  %v436_v62 = vmul.f32 %v2085_v6, %v387_v55 }
  0xf2   :  { %v278_v63 = vpop.f32.mrf.mxu0 }
  0xf3   :  { %v389_v2 = vmax.f32 %v277_v58, 0.0  ;;  %v2133_v3 = vadd.f32 %v278_v63, %v2079_v1  ;;  %469 = vadd.xlane.f32.xlu0 %v436_v62 }
  0xf4   :  { %v282_v4 = vpop.f32.mrf.mxu0 }
  0xf5   :  { %2998 = vst [vmem:[#allocation19_spill] sm:$0xff] %v2133_v3  ;;  %v283_v7 = vadd.f32 %v282_v4, %v2077_v0  ;;  %v437_v9 = vmul.f32 %v2085_v6, %v389_v2 }
  0xf6   :  { %v284_v10 = vpop.f32.mrf.mxu0 }
  0xf7   :  { %v391_v11 = vmax.f32 %v283_v7, 0.0  ;;  %v2138_v12 = vadd.f32 %v284_v10, %v2079_v1  ;;  %471 = vadd.xlane.f32.xlu1 %v437_v9  ;;  %v2177_v9 = vpop.permute.xlu1 %644 }
  0xf8   :  { %v288_v13 = vpop.f32.mrf.mxu0 }
  0xf9   :  { %2999 = vst [vmem:[#allocation20_spill] sm:$0xff] %v2138_v12  ;;  %v289_v15 = vadd.f32 %v288_v13, %v2077_v0  ;;  %v438_v16 = vmul.f32 %v2085_v6, %v391_v11 }
  0xfa   :  { %v290_v17 = vpop.f32.mrf.mxu0 }
  0xfb   :  { %v393_v18 = vmax.f32 %v289_v15, 0.0  ;;  %v2143_v19 = vadd.f32 %v290_v17, %v2079_v1  ;;  %473 = vadd.xlane.f32.xlu0 %v438_v16 }
  0xfc   :  { %v294_v21 = vpop.f32.mrf.mxu0 }
  0xfd   :  { %3000 = vst [vmem:[#allocation21_spill] sm:$0xff] %v2143_v19  ;;  %v295_v22 = vadd.f32 %v294_v21, %v2077_v0  ;;  %v439_v23 = vmul.f32 %v2085_v6, %v393_v18 }
  0xfe   :  { %v296_v24 = vpop.f32.mrf.mxu0 }
  0xff   :  { %v395_v25 = vmax.f32 %v295_v22, 0.0  ;;  %v2148_v27 = vadd.f32 %v296_v24, %v2079_v1  ;;  %475 = vadd.xlane.f32.xlu1 %v439_v23  ;;  %v2186_v23 = vpop.permute.xlu1 %647 }
 0x100   :  { %v300_v28 = vpop.f32.mrf.mxu0 }
 0x101   :  { %3001 = vst [vmem:[#allocation22_spill] sm:$0xff] %v2148_v27  ;;  %v301_v29 = vadd.f32 %v300_v28, %v2077_v0  ;;  %v440_v30 = vmul.f32 %v2085_v6, %v395_v25 }
 0x102   :  { %v302_v31 = vpop.f32.mrf.mxu0 }
 0x103   :  { %v397_v33 = vmax.f32 %v301_v29, 0.0  ;;  %v2153_v34 = vadd.f32 %v302_v31, %v2079_v1  ;;  %477 = vadd.xlane.f32.xlu0 %v440_v30 }
 0x104   :  { %v306_v35 = vpop.f32.mrf.mxu0 }
 0x105   :  { %3002 = vst [vmem:[#allocation23_spill] sm:$0xff] %v2153_v34  ;;  %v307_v36 = vadd.f32 %v306_v35, %v2077_v0  ;;  %v441_v37 = vmul.f32 %v2085_v6, %v397_v33 }
 0x106   :  { %v308_v39 = vpop.f32.mrf.mxu0 }
 0x107   :  { %v399_v40 = vmax.f32 %v307_v36, 0.0  ;;  %v2158_v41 = vadd.f32 %v308_v39, %v2079_v1  ;;  %479 = vadd.xlane.f32.xlu1 %v441_v37  ;;  %v2196_v37 = vpop.permute.xlu1 %650 }
 0x108   :  { %v312_v42 = vpop.f32.mrf.mxu0 }
 0x109   :  { %3003 = vst [vmem:[#allocation24_spill] sm:$0xff] %v2158_v41  ;;  %v313_v43 = vadd.f32 %v312_v42, %v2077_v0  ;;  %v442_v45 = vmul.f32 %v2085_v6, %v399_v40 }
 0x10a   :  { %v314_v46 = vpop.f32.mrf.mxu0 }
 0x10b   :  { %v401_v47 = vmax.f32 %v313_v43, 0.0  ;;  %v2163_v48 = vadd.f32 %v314_v46, %v2079_v1  ;;  %481 = vadd.xlane.f32.xlu0 %v442_v45 }
 0x10c   :  { %v318_v49 = vpop.f32.mrf.mxu0 }
 0x10d   :  { %3004 = vst [vmem:[#allocation25_spill] sm:$0xff] %v2163_v48  ;;  %v319_v51 = vadd.f32 %v318_v49, %v2077_v0  ;;  %v443_v52 = vmul.f32 %v2085_v6, %v401_v47 }
 0x10e   :  { %v320_v54 = vpop.f32.mrf.mxu0 }
 0x10f   :  { %v403_v55 = vmax.f32 %v319_v51, 0.0  ;;  %v2170_v57 = vadd.f32 %v320_v54, %v2079_v1  ;;  %483 = vadd.xlane.f32.xlu1 %v443_v52  ;;  %v2205_v52 = vpop.permute.xlu1 %656 }
 0x110   :  { %v324_v58 = vpop.f32.mrf.mxu0 }
 0x111   :  { %3005 = vst [vmem:[#allocation26_spill] sm:$0xff] %v2170_v57  ;;  %v325_v62 = vadd.f32 %v324_v58, %v2077_v0  ;;  %v444_v63 = vmul.f32 %v2085_v6, %v403_v55 }
 0x112   :  { %v326_v2 = vpop.f32.mrf.mxu0 }
 0x113   :  { %v405_v4 = vmax.f32 %v325_v62, 0.0  ;;  %v2175_v7 = vadd.f32 %v326_v2, %v2079_v1  ;;  %485 = vadd.xlane.f32.xlu0 %v444_v63  ;;  %v2210_v62 = vpop.permute.xlu0 %653 }
 0x114   :  { %v330_v10 = vpop.f32.mrf.mxu0 }
 0x115   :  { %3006 = vst [vmem:[#allocation27_spill] sm:$0xff] %v2175_v7  ;;  %v331_v11 = vadd.f32 %v330_v10, %v2077_v0  ;;  %v445_v13 = vmul.f32 %v2085_v6, %v405_v4 }
 0x116   :  { %v332_v15 = vpop.f32.mrf.mxu0 }
 0x117   :  { %v407_v16 = vmax.f32 %v331_v11, 0.0  ;;  %v2182_v17 = vadd.f32 %v332_v15, %v2079_v1  ;;  %487 = vadd.xlane.f32.xlu1 %v445_v13  ;;  %v2217_v15 = vpop.permute.xlu1 %659 }
 0x118   :  { %v336_v18 = vpop.f32.mrf.mxu0 }
 0x119   :  { %3007 = vst [vmem:[#allocation28_spill] sm:$0xff] %v2182_v17  ;;  %v337_v21 = vadd.f32 %v336_v18, %v2077_v0  ;;  %v446_v22 = vmul.f32 %v2085_v6, %v407_v16 }
 0x11a   :  { %v338_v24 = vpop.f32.mrf.mxu0 }
 0x11b   :  { %v409_v25 = vmax.f32 %v337_v21, 0.0  ;;  %v2189_v28 = vadd.f32 %v338_v24, %v2079_v1  ;;  %489 = vadd.xlane.f32.xlu0 %v446_v22  ;;  %v2221_v22 = vpop.permute.xlu0 %665 }
 0x11c   :  { %v342_v29 = vpop.f32.mrf.mxu0 }
 0x11d   :  { %3008 = vst [vmem:[#allocation29_spill] sm:$0xff] %v2189_v28  ;;  %v343_v30 = vadd.f32 %v342_v29, %v2077_v0  ;;  %v447_v31 = vmul.f32 %v2085_v6, %v409_v25  ;;  %v2224_v29 = vpop.permute.xlu1 %662 }
 0x11e   :  { %v344_v33 = vpop.f32.mrf.mxu0 }
 0x11f   :  { %v411_v35 = vmax.f32 %v343_v30, 0.0  ;;  %v2194_v36 = vadd.f32 %v344_v33, %v2079_v1  ;;  %491 = vadd.xlane.f32.xlu1 %v447_v31  ;;  %v2226_v30 = vpop.permute.xlu0 %668 }
 0x120   :  { %v348_v39 = vpop.f32.mrf.mxu0 }
 0x121   :  { %3009 = vst [vmem:[#allocation30_spill] sm:$0xff] %v2194_v36  ;;  %v349_v40 = vadd.f32 %v348_v39, %v2077_v0  ;;  %v448_v42 = vmul.f32 %v2085_v6, %v411_v35  ;;  %v2228_v31 = vpop.permute.xlu1 %671 }
 0x122   :  { %v350_v43 = vpop.f32.mrf.mxu0 }
 0x123   :  { %v413_v45 = vmax.f32 %v349_v40, 0.0  ;;  %v2201_v46 = vadd.f32 %v350_v43, %v2079_v1  ;;  %493 = vadd.xlane.f32.xlu0 %v448_v42  ;;  %v2230_v33 = vpop.permute.xlu0 %674  ;;  %v558_v42 = vld [vmem:[%s2946_s1 + $0xb8] sm:$0xff] }
 0x124   :  { %v354_v47 = vpop.f32.mrf.mxu0 }
 0x125   :  { %3010 = vst [vmem:[#allocation31_spill] sm:$0xff] %v2201_v46  ;;  %v355_v49 = vadd.f32 %v354_v47, %v2077_v0  ;;  %v449_v51 = vmul.f32 %v2085_v6, %v413_v45  ;;  %v2235_v35 = vpop.permute.xlu1 %677 }
 0x126   :  { %v356_v54 = vpop.f32.mrf.mxu0 }
 0x127   :  { %v415_v55 = vmax.f32 %v355_v49, 0.0  ;;  %v2208_v58 = vadd.f32 %v356_v54, %v2079_v1  ;;  %495 = vadd.xlane.f32.xlu1 %v449_v51  ;;  %v2237_v39 = vpop.permute.xlu0 %680 }
 0x128   :  { %v360_v63 = vpop.f32.mrf.mxu0 }
 0x129   :  { %3011 = vst [vmem:[#allocation32_spill] sm:$0xff] %v2208_v58  ;;  %v361_v2 = vadd.f32 %v360_v63, %v2077_v0  ;;  %v450_v4 = vmul.f32 %v2085_v6, %v415_v55  ;;  %v2239_v40 = vpop.permute.xlu1 %683  ;;  %v2258_v55 = vld [vmem:[#allocation5] ss:$0 sm:$0xff] }
 0x12a   :  { %v362_v10 = vpop.f32.mrf.mxu0 }
 0x12b   :  { %v417_v11 = vmax.f32 %v361_v2, 0.0  ;;  %v2215_v13 = vadd.f32 %v362_v10, %v2079_v1  ;;  %497 = vadd.xlane.f32.xlu0 %v450_v4 }
 0x12c   :  { %v366_v16 = vpop.f32.mrf.mxu0 }
 0x12d   :  { %3012 = vst [vmem:[#allocation33_spill] sm:$0xff] %v2215_v13  ;;  %v367_v18 = vadd.f32 %v366_v16, %v2077_v0  ;;  %v451_v21 = vmul.f32 %v2085_v6, %v417_v11  ;;  %v559_v0 = vld [vmem:[%s2946_s1 + $0xc0] sm:$0xff]  ;;  %v2246_v43 = vpop.permute.xlu1 %689  ;;  %s1810_s1 = smov [#allocation6]  }
 0x12e   :  { %s1664_s11 = sshll.u32 %s1810_s1, 4  ;;  %s1665_s11 = int_to_ptr.vmem [resolvable:$true] %s1664_s11 }
 0x12f   :  { %v419_v24 = vmax.f32 %v367_v18, 0.0  ;;  %499 = vadd.xlane.f32.xlu1 %v451_v21  ;;  %s1785_s12 = scalar_lea.vmem %s1665_s11, 128  ;;  %p1790_p1 = scmp.lt.s32.totalorder %s1665_s11, %s1665_s11 }
 0x130   :  { %p1786_p0 = scmp.ne.s32.totalorder %s1665_s11, %s1785_s12  ;;  %p1791_p2 = scmp.lt.s32.totalorder %s1785_s12, %s1785_s12 }
 0x131   :  { %v452_v25 = vmul.f32 %v2085_v6, %v419_v24  ;;  %v2241_v6 = vpop.permute.xlu0 %686  ;;  %v2250_v47 = vpop.permute.xlu1 %695 }
 0x132   :  { %p1792_p3 = por %p1791_p2, %p1790_p1 }
 0x133   :  { %501 = vadd.xlane.f32.xlu0 %v452_v25 }
 0x134   :  { %p1793_p4 = pnand %p1792_p3, %p1786_p0 }
 0x135   :  { %v2248_v45 = vpop.permute.xlu0 %692  ;;  %v2254_v51 = vpop.permute.xlu1 %701 }
 0x139   :  { %v2252_v49 = vpop.permute.xlu0 %698  ;;  %v2260_v63 = vpop.permute.xlu1 %707 }
 0x13d   :  { %v2256_v54 = vpop.permute.xlu0 %704 }
 0x140   :  { %713 = vperm.xlu1 %1729, %v559_v0  }
 0x149   :  { %710 = vperm.xlu0 %1730, %v558_v42  }
 0x15c   :  { %v454_v2 = vpop.xlane.xlu0 %453 }
 0x15d   :  { %v2263_v4 = vadd.f32 %v2258_v55, %v454_v2 }
 0x15f   :  { %3013 = vst [vmem:[#allocation34_spill] sm:$0xff] %v2263_v4  ;;  %867 = vperm.xlu1 %1729, %v2263_v4  }
 0x160   :  { %v456_v10 = vpop.xlane.xlu1 %455 }
 0x161   :  { %v2267_v11 = vadd.f32 %v2258_v55, %v456_v10 }
 0x163   :  { %3014 = vst [vmem:[#allocation35_spill] sm:$0xff] %v2267_v11  ;;  %872 = vperm.xlu1 %1729, %v2267_v11  }
 0x164   :  { %v458_v16 = vpop.xlane.xlu1 %457 }
 0x165   :  { %v2271_v18 = vadd.f32 %v2258_v55, %v458_v16 }
 0x167   :  { %3015 = vst [vmem:[#allocation36_spill] sm:$0xff] %v2271_v18  ;;  %877 = vperm.xlu0 %1730, %v2271_v18  }
 0x168   :  { %v460_v21 = vpop.xlane.xlu0 %459 }
 0x169   :  { %v2275_v24 = vadd.f32 %v2258_v55, %v460_v21 }
 0x16b   :  { %3016 = vst [vmem:[#allocation37_spill] sm:$0xff] %v2275_v24  ;;  %882 = vperm.xlu1 %1729, %v2275_v24  }
 0x16c   :  { %v462_v25 = vpop.xlane.xlu0 %461 }
 0x16d   :  { %v2279_v0 = vadd.f32 %v2258_v55, %v462_v25 }
 0x16f   :  { %3017 = vst [vmem:[#allocation38_spill] sm:$0xff] %v2279_v0  ;;  %887 = vperm.xlu1 %1729, %v2279_v0  }
 0x170   :  { %v464_v42 = vpop.xlane.xlu1 %463 }
 0x171   :  { %v2283_v2 = vadd.f32 %v2258_v55, %v464_v42 }
 0x173   :  { %3018 = vst [vmem:[#allocation39_spill] sm:$0xff] %v2283_v2  ;;  %892 = vperm.xlu0 %1730, %v2283_v2  }
 0x174   :  { %v466_v10 = vpop.xlane.xlu0 %465 }
 0x175   :  { %v2287_v16 = vadd.f32 %v2258_v55, %v466_v10 }
 0x177   :  { %3019 = vst [vmem:[#allocation40_spill] sm:$0xff] %v2287_v16  ;;  %897 = vperm.xlu1 %1729, %v2287_v16  }
 0x178   :  { %v468_v21 = vpop.xlane.xlu1 %467 }
 0x179   :  { %v2291_v5 = vadd.f32 %v2258_v55, %v468_v21 }
 0x17b   :  { %3020 = vst [vmem:[#allocation41_spill] sm:$0xff] %v2291_v5  ;;  %902 = vperm.xlu0 %1730, %v2291_v5  }
 0x17c   :  { %v470_v25 = vpop.xlane.xlu0 %469 }
 0x17d   :  { %v2295_v61 = vadd.f32 %v2258_v55, %v470_v25 }
 0x17f   :  { %3021 = vst [vmem:[#allocation42_spill] sm:$0xff] %v2295_v61  ;;  %907 = vperm.xlu1 %1729, %v2295_v61  }
 0x180   :  { %v472_v42 = vpop.xlane.xlu1 %471 }
 0x181   :  { %v2299_v59 = vadd.f32 %v2258_v55, %v472_v42 }
 0x183   :  { %3022 = vst [vmem:[#allocation43_spill] sm:$0xff] %v2299_v59  ;;  %912 = vperm.xlu0 %1730, %v2299_v59  }
 0x184   :  { %v474_v10 = vpop.xlane.xlu0 %473 }
 0x185   :  { %v2303_v57 = vadd.f32 %v2258_v55, %v474_v10 }
 0x187   :  { %3023 = vst [vmem:[#allocation44_spill] sm:$0xff] %v2303_v57  ;;  %917 = vperm.xlu1 %1729, %v2303_v57  }
 0x188   :  { %v476_v21 = vpop.xlane.xlu1 %475 }
 0x189   :  { %v2307_v7 = vadd.f32 %v2258_v55, %v476_v21 }
 0x18b   :  { %922 = vperm.xlu0 %1730, %v2307_v7  }
 0x18c   :  { %v478_v25 = vpop.xlane.xlu0 %477 }
 0x18d   :  { %v2311_v17 = vadd.f32 %v2258_v55, %v478_v25 }
 0x18f   :  { %927 = vperm.xlu1 %1729, %v2311_v17  }
 0x190   :  { %v480_v42 = vpop.xlane.xlu1 %479 }
 0x191   :  { %v2315_v28 = vadd.f32 %v2258_v55, %v480_v42 }
 0x193   :  { %932 = vperm.xlu0 %1730, %v2315_v28  }
 0x194   :  { %v482_v10 = vpop.xlane.xlu0 %481 }
 0x195   :  { %v2319_v36 = vadd.f32 %v2258_v55, %v482_v10 }
 0x197   :  { %937 = vperm.xlu1 %1729, %v2319_v36  }
 0x198   :  { %v484_v21 = vpop.xlane.xlu1 %483 }
 0x199   :  { %v2323_v46 = vadd.f32 %v2258_v55, %v484_v21 }
 0x19b   :  { %942 = vperm.xlu0 %1730, %v2323_v46  }
 0x19c   :  { %v486_v25 = vpop.xlane.xlu0 %485 }
 0x19d   :  { %v2327_v58 = vadd.f32 %v2258_v55, %v486_v25 }
 0x19f   :  { %3024 = vst [vmem:[#allocation45_spill] sm:$0xff] %v2327_v58  ;;  %947 = vperm.xlu1 %1729, %v2327_v58  }
 0x1a0   :  { %v488_v42 = vpop.xlane.xlu1 %487 }
 0x1a1   :  { %v2331_v13 = vadd.f32 %v2258_v55, %v488_v42 }
 0x1a3   :  { %3025 = vst [vmem:[#allocation46_spill] sm:$0xff] %v2331_v13  ;;  %952 = vperm.xlu0 %1730, %v2331_v13  }
 0x1a4   :  { %v490_v10 = vpop.xlane.xlu0 %489 }
 0x1a5   :  { %v2335_v8 = vadd.f32 %v2258_v55, %v490_v10 }
 0x1a7   :  { %3026 = vst [vmem:[#allocation47_spill] sm:$0xff] %v2335_v8  ;;  %957 = vperm.xlu1 %1729, %v2335_v8  }
 0x1a8   :  { %v492_v21 = vpop.xlane.xlu1 %491 }
 0x1a9   :  { %v2339_v1 = vadd.f32 %v2258_v55, %v492_v21 }
 0x1ab   :  { %3027 = vst [vmem:[#allocation48_spill] sm:$0xff] %v2339_v1  ;;  %962 = vperm.xlu0 %1730, %v2339_v1  }
 0x1ac   :  { %v494_v25 = vpop.xlane.xlu0 %493 }
 0x1ad   :  { %v2343_v14 = vadd.f32 %v2258_v55, %v494_v25 }
 0x1af   :  { %3028 = vst [vmem:[#allocation49_spill] sm:$0xff] %v2343_v14  ;;  %967 = vperm.xlu1 %1729, %v2343_v14  }
 0x1b0   :  { %v496_v42 = vpop.xlane.xlu1 %495 }
 0x1b1   :  { %v2347_v20 = vadd.f32 %v2258_v55, %v496_v42 }
 0x1b3   :  { %3029 = vst [vmem:[#allocation50_spill] sm:$0xff] %v2347_v20  ;;  %972 = vperm.xlu0 %1730, %v2347_v20  }
 0x1b4   :  { %v498_v10 = vpop.xlane.xlu0 %497 }
 0x1b5   :  { %v2351_v26 = vadd.f32 %v2258_v55, %v498_v10 }
 0x1b7   :  { %3030 = vst [vmem:[#allocation51_spill] sm:$0xff] %v2351_v26  ;;  %977 = vperm.xlu1 %1729, %v2351_v26  }
 0x1b8   :  { %v500_v21 = vpop.xlane.xlu1 %499 }
 0x1b9   :  { %v2355_v32 = vadd.f32 %v2258_v55, %v500_v21 }
 0x1bb   :  { %3031 = vst [vmem:[#allocation52_spill] sm:$0xff] %v2355_v32  ;;  %982 = vperm.xlu0 %1730, %v2355_v32  }
 0x1bc   :  { %v502_v25 = vpop.xlane.xlu0 %501  ;;  %v2363_v10 = vpop.permute.xlu1 %713 }
 0x1bd   :  { %v2360_v42 = vadd.f32 %v2258_v55, %v502_v25  ;;  %v3033_v25 = vlaneseq }
 0x1bf   :  { %3032 = vst [vmem:[#allocation53_spill] sm:$0xff] %v2360_v42  ;;  %987 = vperm.xlu1 %1729, %v2360_v42   ;;  %v2368_v58 = vand.u32 127, %v3033_v25 }
 0x1c1   :  { %vm2965_vm2 = vcmp.eq.s32.totalorder %v2167_v53, %v2368_v58  ;;  %vm2966_vm3 = vcmp.eq.s32.totalorder %v2177_v9, %v2368_v58  ;;  %vm2974_vm4 = vcmp.eq.s32.totalorder %v2186_v23, %v2368_v58  ;;  %vm2977_vm5 = vcmp.eq.s32.totalorder %v2196_v37, %v2368_v58 }
 0x1c2   :  { %vm2971_vm6 = vcmp.eq.s32.totalorder %v2205_v52, %v2368_v58  ;;  %vm2972_vm7 = vcmp.eq.s32.totalorder %v2217_v15, %v2368_v58  ;;  %vm722_vm8 = vcmp.eq.s32.totalorder %v2224_v29, %v2368_v58  ;;  %vm2986_vm9 = vcmp.eq.s32.totalorder %v2228_v31, %v2368_v58 }
 0x1c3   :  { %vm727_vm11 = vcmp.eq.s32.totalorder %v2235_v35, %v2368_v58  ;;  %vm2970_vm12 = vcmp.eq.s32.totalorder %v2210_v62, %v2368_v58  ;;  %vm2978_vm13 = vcmp.eq.s32.totalorder %v2221_v22, %v2368_v58  ;;  %vm724_vm14 = vcmp.eq.s32.totalorder %v2226_v30, %v2368_v58 }
 0x1c4   :  { %v2365_v56 = vpop.permute.xlu0 %710  ;;  %vm726_vm15 = vcmp.eq.s32.totalorder %v2230_v33, %v2368_v58  ;;  %vm729_vm0 = vcmp.eq.s32.totalorder %v2239_v40, %v2368_v58  ;;  %vm2987_vm1 = vcmp.eq.s32.totalorder %v2252_v49, %v2368_v58 }
 0x1da   :  { %v868_v44 = vpop.permute.xlu1 %867 }
 0x1db   :  { %v990_v25 = vsel %vm2965_vm2, %v868_v44, -1e+30  ;;  %vm728_vm2 = vcmp.eq.s32.totalorder %v2237_v39, %v2368_v58 }
 0x1dc   :  { %v1016_v42 = vsel %vm1015_vm10, %v990_v25, -inf }
 0x1de   :  { %v873_v50 = vpop.permute.xlu1 %872 }
 0x1df   :  { %v991_v32 = vsel %vm2966_vm3, %v873_v50, -1e+30  ;;  %vm731_vm3 = vcmp.eq.s32.totalorder %v2246_v43, %v2368_v58 }
 0x1e0   :  { %v1017_v18 = vsel %vm1015_vm10, %v991_v32, -inf }
 0x1e2   :  { %v878_v3 = vpop.permute.xlu0 %877 }
 0x1e6   :  { %v883_v21 = vpop.permute.xlu1 %882 }
 0x1ea   :  { %v888_v12 = vpop.permute.xlu1 %887 }
 0x1eb   :  { %v994_v44 = vsel %vm2970_vm12, %v888_v12, -1e+30  ;;  %vm730_vm12 = vcmp.eq.s32.totalorder %v2241_v6, %v2368_v58  ;;  %v992_v12 = vsel %vm2974_vm4, %v878_v3, -1e+30  ;;  %vm738_vm4 = vcmp.eq.s32.totalorder %v2365_v56, %v2368_v58 }
 0x1ec   :  { %v1020_v3 = vsel %vm1015_vm10, %v994_v44, -inf }
 0x1ed   :  { %v1021_v24 = vmax.f32 %v1016_v42, %v1020_v3 }
 0x1ee   :  { %v893_v19 = vpop.permute.xlu0 %892 }
 0x1ef   :  { %v995_v50 = vsel %vm2971_vm6, %v893_v19, -1e+30  ;;  %v993_v19 = vsel %vm2977_vm5, %v883_v21, -1e+30  ;;  %vm735_vm6 = vcmp.eq.s32.totalorder %v2254_v51, %v2368_v58  ;;  %vm736_vm5 = vcmp.eq.s32.totalorder %v2256_v54, %v2368_v58 }
 0x1f0   :  { %v1022_v25 = vsel %vm1015_vm10, %v995_v50, -inf  ;;  %v1019_v50 = vsel %vm1015_vm10, %v993_v19, -inf }
 0x1f1   :  { %v1023_v16 = vmax.f32 %v1017_v18, %v1022_v25 }
 0x1f2   :  { %v898_v27 = vpop.permute.xlu1 %897 }
 0x1f3   :  { %v996_v4 = vsel %vm2972_vm7, %v898_v27, -1e+30  ;;  %vm733_vm7 = vcmp.eq.s32.totalorder %v2250_v47, %v2368_v58 }
 0x1f4   :  { %v1024_v21 = vsel %vm1015_vm10, %v996_v4, -inf }
 0x1f6   :  { %v903_v34 = vpop.permute.xlu0 %902 }
 0x1f7   :  { %v997_v27 = vsel %vm722_vm8, %v903_v34, -1e+30 }
 0x1fa   :  { %v908_v41 = vpop.permute.xlu1 %907 }
 0x1fb   :  { %v998_v34 = vsel %vm2978_vm13, %v908_v41, -1e+30  ;;  %vm737_vm13 = vcmp.eq.s32.totalorder %v2260_v63, %v2368_v58  ;;  %v1018_v41 = vsel %vm1015_vm10, %v992_v12, -inf }
 0x1fc   :  { %v1028_v2 = vsel %vm1015_vm10, %v998_v34, -inf }
 0x1fd   :  { %v1029_v42 = vmax.f32 %v1021_v24, %v1028_v2 }
 0x1fe   :  { %v913_v48 = vpop.permute.xlu0 %912 }
 0x1ff   :  { %v999_v11 = vsel %vm724_vm14, %v913_v48, -1e+30  ;;  %v1026_v48 = vsel %vm1015_vm10, %v997_v27, -inf }
 0x200   :  { %v1030_v5 = vsel %vm1015_vm10, %v999_v11, -inf  ;;  %v1027_v27 = vmax.f32 %v1019_v50, %v1026_v48 }
 0x202   :  { %v918_v38 = vpop.permute.xlu1 %917 }
 0x203   :  { %v1000_v0 = vsel %vm2986_vm9, %v918_v38, -1e+30  ;;  %vm3034_vm9 = vcmp.eq.s32.totalorder %v2248_v45, %v2368_v58 }
 0x204   :  { %v1032_v57 = vsel %vm1015_vm10, %v1000_v0, -inf }
 0x206   :  { %v923_v13 = vpop.permute.xlu0 %922 }
 0x207   :  { %v1001_v44 = vsel %vm726_vm15, %v923_v13, -1e+30  ;;  %v1025_v13 = vmax.f32 %v1018_v41, %v1024_v21 }
 0x208   :  { %v1034_v12 = vsel %vm1015_vm10, %v1001_v44, -inf }
 0x209   :  { %v1033_v25 = vmax.f32 %v1025_v13, %v1032_v57  ;;  %v1035_v21 = vmax.f32 %v1027_v27, %v1034_v12 }
 0x20a   :  { %v928_v55 = vpop.permute.xlu1 %927 }
 0x20b   :  { %v1002_v38 = vsel %vm727_vm11, %v928_v55, -1e+30 }
 0x20c   :  { %v1036_v59 = vsel %vm1015_vm10, %v1002_v38, -inf }
 0x20d   :  { %v1037_v44 = vmax.f32 %v1029_v42, %v1036_v59 }
 0x20e   :  { %v2370_v1 = vpop.permute.xlu0 %932 }
 0x20f   :  { %v1003_v18 = vsel %vm728_vm2, %v2370_v1, -1e+30  ;;  %v1031_v1 = vmax.f32 %v1023_v16, %v1030_v5 }
 0x210   :  { %v1038_v24 = vsel %vm1015_vm10, %v1003_v18, -inf }
 0x211   :  { %v1039_v50 = vmax.f32 %v1031_v1, %v1038_v24 }
 0x212   :  { %v2372_v20 = vpop.permute.xlu1 %937 }
 0x213   :  { %v1004_v11 = vsel %vm729_vm0, %v2372_v20, -1e+30 }
 0x214   :  { %v1040_v2 = vsel %vm1015_vm10, %v1004_v11, -inf }
 0x215   :  { %v1041_v12 = vmax.f32 %v1033_v25, %v1040_v2 }
 0x216   :  { %v943_v8 = vpop.permute.xlu0 %942 }
 0x217   :  { %v1005_v19 = vsel %vm730_vm12, %v943_v8, -1e+30 }
 0x218   :  { %v1042_v34 = vsel %vm1015_vm10, %v1005_v19, -inf }
 0x219   :  { %v1043_v59 = vmax.f32 %v1035_v21, %v1042_v34 }
 0x21a   :  { %v948_v14 = vpop.permute.xlu1 %947 }
 0x21b   :  { %v1006_v55 = vsel %vm731_vm3, %v948_v14, -1e+30 }
 0x21c   :  { %v1044_v5 = vsel %vm1015_vm10, %v1006_v55, -inf }
 0x21d   :  { %v1045_v19 = vmax.f32 %v1037_v44, %v1044_v5 }
 0x21e   :  { %v953_v26 = vpop.permute.xlu0 %952 }
 0x21f   :  { %v1007_v8 = vsel %vm3034_vm9, %v953_v26, -1e+30  ;;  %vm739_vm9 = vcmp.eq.s32.totalorder %v2363_v10, %v2368_v58 }
 0x220   :  { %v1046_v57 = vsel %vm1015_vm10, %v1007_v8, -inf }
 0x221   :  { %v1047_v18 = vmax.f32 %v1039_v50, %v1046_v57 }
 0x222   :  { %v958_v32 = vpop.permute.xlu1 %957 }
 0x223   :  { %v1008_v14 = vsel %vm733_vm7, %v958_v32, -1e+30 }
 0x224   :  { %v1048_v48 = vsel %vm1015_vm10, %v1008_v14, -inf }
 0x225   :  { %v1049_v55 = vmax.f32 %v1041_v12, %v1048_v48  ;;  %v3037_v48 = vmov 0.0  }
 0x226   :  { %v963_v4 = vpop.permute.xlu0 %962  ;;  %v2566_v40 = vsel %vm728_vm2, 1.0, %v3037_v48  ;;  %v2578_v33 = vsel %vm724_vm14, 1.0, %v3037_v48  ;;  %v2584_v39 = vsel %vm727_vm11, 1.0, %v3037_v48  ;;  %v2596_v30 = vsel %vm722_vm8, 1.0, %v3037_v48 }
 0x227   :  { %v1009_v3 = vsel %vm2987_vm1, %v963_v4, -1e+30  ;;  %vm3036_vm1 = vcmask 57344   ;;  %vm3039_vm2 = vcmp.eq.s32.totalorder %v2205_v52, %v2368_v58  ;;  %vm3040_vm8 = vcmp.eq.s32.totalorder %v2221_v22, %v2368_v58 }
 0x228   :  { %v1050_v16 = vsel %vm1015_vm10, %v1009_v3, -inf  ;;  %v2614_v29 = vsel %vm3039_vm2, 1.0, %v3037_v48  ;;  %vm3041_vm11 = vcmp.eq.s32.totalorder %v2196_v37, %v2368_v58  ;;  %vm3043_vm14 = vcmp.eq.s32.totalorder %v2177_v9, %v2368_v58 }
 0x229   :  { %v1051_v27 = vmax.f32 %v1043_v59, %v1050_v16  ;;  %v2632_v52 = vsel %vm3041_vm11, 1.0, %v3037_v48  ;;  %v2650_v37 = vsel %vm3043_vm14, 1.0, %v3037_v48  ;;  %v2668_v9 = vsel %vm739_vm9, 1.0, %v3037_v48 }
 0x22a   :  { %v968_v61 = vpop.permute.xlu1 %967  ;;  %v2710_v63 = vsel %vm735_vm6, 1.0, %v3037_v48  ;;  %v2722_v56 = vsel %vm733_vm7, 1.0, %v3037_v48  ;;  %v2728_v51 = vsel %vm736_vm5, 1.0, %v3037_v48  ;;  %v2740_v47 = vsel %vm731_vm3, 1.0, %v3037_v48 }
 0x22b   :  { %v1010_v26 = vsel %vm735_vm6, %v968_v61, -1e+30  ;;  %vm3048_vm3 = vcmp.eq.s32.totalorder %v2248_v45, %v2368_v58  ;;  %vm1553_vm6 = vcmask 588800  }
 0x22c   :  { %v1052_v38 = vsel %vm1015_vm10, %v1010_v26, -inf  ;;  %v2758_v43 = vsel %vm3048_vm3, 1.0, %v3037_v48 }
 0x22d   :  { %v1053_v8 = vmax.f32 %v1045_v19, %v1052_v38  ;;  %v2544_v38 = vsel %vm729_vm0, 1.0, %v3037_v48  ;;  %v2560_v19 = vsel %vm726_vm15, 1.0, %v3037_v48  ;;  %vm3044_vm15 = vcmp.eq.s32.totalorder %v2210_v62, %v2368_v58 }
 0x22e   :  { %v973_v0 = vpop.permute.xlu0 %972  ;;  %vm3045_vm0 = vcmp.eq.s32.totalorder %v2186_v23, %v2368_v58  ;;  %v2692_v23 = vsel %vm737_vm13, 1.0, %v3037_v48 }
 0x22f   :  { %v1011_v41 = vsel %vm736_vm5, %v973_v0, -1e+30  ;;  %v2674_v62 = vsel %vm3045_vm0, 1.0, %v3037_v48  ;;  %vm32_vm5 = vcmask 7168  }
 0x230   :  { %v1054_v11 = vsel %vm1015_vm10, %v1011_v41, -inf  ;;  %33 = vst.msk [vmem:[#allocation3] sm:$0xff] %vm32_vm5, %v3037_v48 }
 0x231   :  { %v1055_v21 = vmax.f32 %v1047_v18, %v1054_v11 }
 0x232   :  { %v978_v20 = vpop.permute.xlu1 %977 }
 0x233   :  { %v1012_v32 = vsel %vm737_vm13, %v978_v20, -1e+30 }
 0x234   :  { %v1056_v0 = vsel %vm1015_vm10, %v1012_v32, -inf }
 0x235   :  { %v1057_v34 = vmax.f32 %v1049_v55, %v1056_v0 }
 0x236   :  { %v983_v4 = vpop.permute.xlu0 %982 }
 0x237   :  { %v1013_v61 = vsel %vm738_vm4, %v983_v4, -1e+30  ;;  %v2526_v4 = vld [vmem:[#allocation2] sm:$0x1] }
 0x238   :  { %v1058_v13 = vsel %vm1015_vm10, %v1013_v61, -inf  ;;  %v3035_v61 = vsub.s32 0, %v2068_v60 }
 0x239   :  { %v1059_v3 = vmax.f32 %v1051_v27, %v1058_v13  ;;  %v2550_v13 = vsel %vm730_vm12, 1.0, %v3037_v48  ;;  %vm3042_vm12 = vcmp.eq.s32.totalorder %v2217_v15, %v2368_v58  ;;  %v2656_v15 = vsel %vm3044_vm15, 1.0, %v3037_v48 }
 0x23a   :  { %v988_v42 = vpop.permute.xlu1 %987  ;;  %v2638_v22 = vsel %vm3042_vm12, 1.0, %v3037_v48 }
 0x23b   :  { %v1014_v1 = vsel %vm739_vm9, %v988_v42, -1e+30  ;;  %v1063_v44 = vmax.f32 %v1057_v34, %v1059_v3  ;;  %vm3046_vm9 = vcmp.eq.s32.totalorder %v2167_v53, %v2368_v58  ;;  %v2704_v53 = vsel %vm738_vm4, 1.0, %v3037_v48 }
 0x23c   :  { %v1060_v25 = vsel %vm1015_vm10, %v1014_v1, -inf  ;;  %v2686_v10 = vsel %vm3046_vm9, 1.0, %v3037_v48  ;;  %vm3047_vm4 = vcmp.eq.s32.totalorder %v2252_v49, %v2368_v58 }
 0x23d   :  { %v1061_v20 = vmax.f32 %v1053_v8, %v1060_v25  ;;  %v2746_v54 = vsel %vm3047_vm4, 1.0, %v3037_v48 }
 0x23f   :  { %v1062_v24 = vmax.f32 %v1061_v20, %v1055_v21 }
 0x241   :  { %v1064_v14 = vmax.f32 %v1062_v24, %v1063_v44 }
 0x243   :  { %v1065_v26 = vrot.slane %v1064_v14, 4 }
 0x245   :  { %v1066_v2 = vmax.f32 %v1064_v14, %v1065_v26 }
 0x247   :  { %v1067_v5 = vrot.slane %v1066_v2, 2 }
 0x249   :  { %v1068_v57 = vmax.f32 %v1066_v2, %v1067_v5 }
 0x24b   :  { %v1069_v16 = vrot.slane %v1068_v57, 1 }
 0x24d   :  { %v1070_v59 = vmax.f32 %v1068_v57, %v1069_v16 }
 0x24f   :  { %v2529_v41 = vmax.f32 %v2526_v4, %v1070_v59 }
 0x251   :  { %v1073_v32 = vsub.f32 %v2526_v4, %v2529_v41  ;;  %v2536_v50 = vrot.slane %v2529_v41, %v3035_v61  ;;  %1643 = vst.msk [vmem:[#allocation2] sm:$0x1] %vm3036_vm1, %v2529_v41  ;;  %vm3038_vm1 = vcmp.eq.s32.totalorder %v2228_v31, %v2368_v58  ;;  %v2620_v31 = vsel %vm3040_vm8, 1.0, %v3037_v48  ;;  %v3069_v4 = vld [vmem:[#allocation25_spill] sm:$0xff] }
 0x252   :  { %v2602_v35 = vsel %vm3038_vm1, 1.0, %v3037_v48  ;;  %v402_v41 = vmax.f32 %v3069_v4, 0.0  ;;  %v3080_v4 = vld [vmem:[#allocation14_spill] sm:$0xff] }
 0x253   :  { %v1129_v60 = vmul.f32 %v2550_v13, %v2536_v50  ;;  %v1128_v12 = vmul.f32 %v2544_v38, %v2536_v50  ;;  %v1127_v18 = vmul.f32 %v2566_v40, %v2536_v50  ;;  %v1125_v11 = vmul.f32 %v2560_v19, %v2536_v50 }
 0x254   :  { %v1126_v55 = vmul.f32 %v2584_v39, %v2536_v50  ;;  %v1123_v8 = vmul.f32 %v2578_v33, %v2536_v50  ;;  %v1124_v25 = vmul.f32 %v2602_v35, %v2536_v50  ;;  %v1121_v21 = vmul.f32 %v2596_v30, %v2536_v50 }
 0x255   :  { %v1184_v6 = vsel %vm1015_vm10, %v1129_v60, 0.0  ;;  %v1181_v27 = vsel %vm1015_vm10, %v1128_v12, 0.0  ;;  %v1178_v0 = vsel %vm1015_vm10, %v1127_v18, 0.0  ;;  %v1172_v42 = vsel %vm1015_vm10, %v1125_v11, 0.0 }
 0x256   :  { %1185 = vadd.xlane.f32.xlu0 %v1184_v6  ;;  %1182 = vadd.xlane.f32.xlu1 %v1181_v27  ;;  %v1175_v3 = vsel %vm1015_vm10, %v1126_v55, 0.0  ;;  %v1166_v1 = vsel %vm1015_vm10, %v1123_v8, 0.0  ;;  %v1169_v34 = vsel %vm1015_vm10, %v1124_v25, 0.0  ;;  %v1160_v20 = vsel %vm1015_vm10, %v1121_v21, 0.0 }
 0x257   :  { %v1122_v44 = vmul.f32 %v2620_v31, %v2536_v50  ;;  %v1119_v24 = vmul.f32 %v2614_v29, %v2536_v50  ;;  %v1120_v2 = vmul.f32 %v2638_v22, %v2536_v50  ;;  %v1117_v5 = vmul.f32 %v2632_v52, %v2536_v50 }
 0x258   :  { %v1118_v59 = vmul.f32 %v2656_v15, %v2536_v50  ;;  %v1115_v61 = vmul.f32 %v2650_v37, %v2536_v50  ;;  %v1116_v6 = vmul.f32 %v2674_v62, %v2536_v50  ;;  %v1138_v27 = vmul.f32 %v2668_v9, %v2536_v50 }
 0x259   :  { %v1163_v14 = vsel %vm1015_vm10, %v1122_v44, 0.0  ;;  %v1154_v26 = vsel %vm1015_vm10, %v1119_v24, 0.0  ;;  %v1157_v57 = vsel %vm1015_vm10, %v1120_v2, 0.0  ;;  %v1148_v16 = vsel %vm1015_vm10, %v1117_v5, 0.0 }
 0x25a   :  { %1179 = vadd.xlane.f32.xlu0 %v1178_v0  ;;  %1173 = vadd.xlane.f32.xlu1 %v1172_v42  ;;  %v1151_v60 = vsel %vm1015_vm10, %v1118_v59, 0.0  ;;  %v1142_v12 = vsel %vm1015_vm10, %v1115_v61, 0.0  ;;  %v1145_v18 = vsel %vm1015_vm10, %v1116_v6, 0.0  ;;  %v1211_v11 = vsel %vm1015_vm10, %v1138_v27, 0.0 }
 0x25b   :  { %v1136_v0 = vmul.f32 %v2692_v23, %v2536_v50  ;;  %v1114_v42 = vmul.f32 %v2686_v10, %v2536_v50  ;;  %v1131_v5 = vmul.f32 %v2758_v43, %v2536_v50 }
 0x25d   :  { %v1205_v55 = vsel %vm1015_vm10, %v1136_v0, 0.0  ;;  %v1139_v8 = vsel %vm1015_vm10, %v1114_v42, 0.0 }
 0x25e   :  { %1176 = vadd.xlane.f32.xlu0 %v1175_v3  ;;  %1167 = vadd.xlane.f32.xlu1 %v1166_v1  ;;  %v1134_v3 = vmul.f32 %v2710_v63, %v2536_v50  ;;  %v1137_v1 = vmul.f32 %v2704_v53, %v2536_v50 }
 0x260   :  { %v1199_v25 = vsel %vm1015_vm10, %v1134_v3, 0.0  ;;  %v1208_v21 = vsel %vm1015_vm10, %v1137_v1, 0.0 }
 0x262   :  { %1170 = vadd.xlane.f32.xlu0 %v1169_v34  ;;  %1161 = vadd.xlane.f32.xlu1 %v1160_v20  ;;  %v1132_v34 = vmul.f32 %v2722_v56, %v2536_v50  ;;  %v1135_v20 = vmul.f32 %v2728_v51, %v2536_v50 }
 0x264   :  { %v1193_v44 = vsel %vm1015_vm10, %v1132_v34, 0.0  ;;  %v1202_v24 = vsel %vm1015_vm10, %v1135_v20, 0.0  ;;  %v3051_v34 = vld [vmem:[#allocation41_spill] sm:$0xff] }
 0x266   :  { %1164 = vadd.xlane.f32.xlu0 %v1163_v14  ;;  %1155 = vadd.xlane.f32.xlu1 %v1154_v26  ;;  %v1130_v14 = vmul.f32 %v2740_v47, %v2536_v50  ;;  %v1133_v26 = vmul.f32 %v2746_v54, %v2536_v50 }
 0x268   :  { %v1187_v49 = vsel %vm1015_vm10, %v1130_v14, 0.0  ;;  %v1196_v2 = vsel %vm1015_vm10, %v1133_v26, 0.0  ;;  %v3052_v14 = vld [vmem:[#allocation42_spill] sm:$0xff] }
 0x26a   :  { %1158 = vadd.xlane.f32.xlu0 %v1157_v57  ;;  %1149 = vadd.xlane.f32.xlu1 %v1148_v16  ;;  %v1190_v57 = vsel %vm1015_vm10, %v1131_v5, 0.0 }
 0x26e   :  { %1152 = vadd.xlane.f32.xlu0 %v1151_v60  ;;  %1143 = vadd.xlane.f32.xlu1 %v1142_v12 }
 0x272   :  { %1146 = vadd.xlane.f32.xlu0 %v1145_v18  ;;  %1212 = vadd.xlane.f32.xlu1 %v1211_v11 }
 0x276   :  { %1206 = vadd.xlane.f32.xlu1 %v1205_v55  ;;  %1140 = vadd.xlane.f32.xlu0 %v1139_v8 }
 0x27a   :  { %1200 = vadd.xlane.f32.xlu1 %v1199_v25  ;;  %1209 = vadd.xlane.f32.xlu0 %v1208_v21  ;;  %v3050_v25 = vld [vmem:[#allocation44_spill] sm:$0xff] }
 0x27e   :  { %1194 = vadd.xlane.f32.xlu1 %v1193_v44  ;;  %1203 = vadd.xlane.f32.xlu0 %v1202_v24 }
 0x282   :  { %1188 = vadd.xlane.f32.xlu1 %v1187_v49  ;;  %1197 = vadd.xlane.f32.xlu0 %v1196_v2  ;;  %v3053_v2 = vld [vmem:[#allocation39_spill] sm:$0xff] }
 0x286   :  { %1191 = vadd.xlane.f32.xlu0 %v1190_v57 }
 0x2df   :  { %v1186_v16 = vpop.xlane.xlu0 %1185  ;;  %v1183_v59 = vpop.xlane.xlu1 %1182 }
 0x2e0   :  { %v1229_v61 = vsub.f32 %v2323_v46, %v1186_v16  ;;  %v1228_v58 = vsub.f32 %v2319_v36, %v1183_v59  ;;  %v3049_v46 = vld [vmem:[#allocation43_spill] sm:$0xff] }
 0x2e2   :  { %v1294_v45 = vmul.f32 1.442695, %v1229_v61  ;;  %v1292_v60 = vmul.f32 1.442695, %v1228_v58  ;;  %v3054_v58 = vld [vmem:[#allocation40_spill] sm:$0xff] }
 0x2e3   :  { %v1180_v12 = vpop.xlane.xlu0 %1179  ;;  %v1174_v6 = vpop.xlane.xlu1 %1173 }
 0x2e4   :  { %1731 = vpow2.f32 %v1294_v45  ;;  %v1227_v27 = vsub.f32 %v2315_v28, %v1180_v12  ;;  %v1225_v50 = vsub.f32 %v2307_v7, %v1174_v6  ;;  %v3055_v6 = vld [vmem:[#allocation37_spill] sm:$0xff] }
 0x2e5   :  { %1733 = vpow2.f32 %v1292_v60 }
 0x2e6   :  { %v1290_v18 = vmul.f32 1.442695, %v1227_v27  ;;  %v1286_v55 = vmul.f32 1.442695, %v1225_v50 }
 0x2e7   :  { %v1177_v11 = vpop.xlane.xlu0 %1176  ;;  %v1168_v0 = vpop.xlane.xlu1 %1167 }
 0x2e8   :  { %1735 = vpow2.f32 %v1290_v18  ;;  %v1226_v42 = vsub.f32 %v2311_v17, %v1177_v11  ;;  %v1223_v8 = vsub.f32 %v3049_v46, %v1168_v0  ;;  %v3056_v0 = vld [vmem:[#allocation38_spill] sm:$0xff] }
 0x2ea   :  { %v1288_v36 = vmul.f32 1.442695, %v1226_v42  ;;  %v1282_v28 = vmul.f32 1.442695, %v1223_v8  ;;  %v3057_v8 = vld [vmem:[#allocation35_spill] sm:$0xff] }
 0x2eb   :  { %v1171_v3 = vpop.xlane.xlu0 %1170  ;;  %v1162_v1 = vpop.xlane.xlu1 %1161 }
 0x2ec   :  { %1737 = vpow2.f32 %v1288_v36  ;;  %v1224_v21 = vsub.f32 %v3050_v25, %v1171_v3  ;;  %v1221_v20 = vsub.f32 %v3051_v34, %v1162_v1 }
 0x2ed   :  { %1739 = vpow2.f32 %v1286_v55 }
 0x2ee   :  { %v1284_v7 = vmul.f32 1.442695, %v1224_v21  ;;  %v1278_v49 = vmul.f32 1.442695, %v1221_v20  ;;  %v3059_v20 = vld [vmem:[#allocation53_spill] sm:$0xff] }
 0x2ef   :  { %v1165_v44 = vpop.xlane.xlu0 %1164  ;;  %v1156_v24 = vpop.xlane.xlu1 %1155 }
 0x2f0   :  { %1741 = vpow2.f32 %v1284_v7  ;;  %v1222_v26 = vsub.f32 %v3052_v14, %v1165_v44  ;;  %v1219_v5 = vsub.f32 %v3053_v2, %v1156_v24 }
 0x2f1   :  { %v1732_v17 = vpop.eup %1731  ;;  %1743 = vpow2.f32 %v1282_v28  ;;  %v3058_v28 = vld [vmem:[#allocation36_spill] sm:$0xff] }
 0x2f2   :  { %v2775_v57 = vpop.eup %1733  ;;  %v1280_v16 = vmul.f32 1.442695, %v1222_v26  ;;  %1557 = vmatprep.subr.mxu1 %v1732_v17  ;;  %1391 = vperm.xlu0 %1730, %v1732_v17   ;;  %v1274_v12 = vmul.f32 1.442695, %v1219_v5  ;;  %v3060_v5 = vld [vmem:[#allocation51_spill] sm:$0xff] }
 0x2f3   :  { %1386 = vperm.xlu1 %1729, %v2775_v57   ;;  %v1159_v59 = vpop.xlane.xlu0 %1158  ;;  %v1150_v61 = vpop.xlane.xlu1 %1149 }
 0x2f4   :  { %1745 = vpow2.f32 %v1280_v16  ;;  %v1220_v45 = vsub.f32 %v3054_v58, %v1159_v59  ;;  %v1217_v27 = vsub.f32 %v3055_v6, %v1150_v61  ;;  %v3061_v59 = vld [vmem:[#allocation34_spill] sm:$0xff] }
 0x2f5   :  { %v2779_v60 = vpop.eup %1735  ;;  %1747 = vpow2.f32 %v1278_v49 }
 0x2f6   :  { %v1276_v50 = vmul.f32 1.442695, %v1220_v45  ;;  %v1270_v46 = vmul.f32 1.442695, %v1217_v27 }
 0x2f7   :  { %1381 = vperm.xlu1 %1729, %v2779_v60   ;;  %v1153_v18 = vpop.xlane.xlu0 %1152  ;;  %v1144_v11 = vpop.xlane.xlu1 %1143 }
 0x2f8   :  { %1749 = vpow2.f32 %v1276_v50  ;;  %v1218_v42 = vsub.f32 %v3056_v0, %v1153_v18  ;;  %v1215_v36 = vsub.f32 %v3057_v8, %v1144_v11  ;;  %v3062_v18 = vld [vmem:[#allocation49_spill] sm:$0xff]  ;;  %v3063_v0 = vld [vmem:[#allocation52_spill] sm:$0xff] }
 0x2f9   :  { %v2784_v55 = vpop.eup %1737  ;;  %1751 = vpow2.f32 %v1274_v12 }
 0x2fa   :  { %v2787_v3 = vpop.eup %1739  ;;  %v1272_v1 = vmul.f32 1.442695, %v1218_v42  ;;  %1376 = vperm.xlu0 %1730, %v2784_v55   ;;  %v1266_v24 = vmul.f32 1.442695, %v1215_v36 }
 0x2fb   :  { %1371 = vperm.xlu1 %1729, %v2787_v3   ;;  %v1147_v25 = vpop.xlane.xlu0 %1146  ;;  %v1213_v21 = vpop.xlane.xlu1 %1212 }
 0x2fc   :  { %1753 = vpow2.f32 %v1272_v1  ;;  %v1216_v34 = vsub.f32 %v3058_v28, %v1147_v25  ;;  %v1238_v7 = vsub.f32 %v3059_v20, %v1213_v21  ;;  %v3064_v28 = vld [vmem:[#allocation47_spill] sm:$0xff]  ;;  %v3065_v20 = vld [vmem:[#allocation50_spill] sm:$0xff] }
 0x2fd   :  { %v2793_v44 = vpop.eup %1741  ;;  %1755 = vpow2.f32 %v1270_v46 }
 0x2fe   :  { %v2795_v14 = vpop.eup %1743  ;;  %v1268_v26 = vmul.f32 1.442695, %v1216_v34  ;;  %1366 = vperm.xlu0 %1730, %v2793_v44   ;;  %v1312_v2 = vmul.f32 1.442695, %v1238_v7 }
 0x2ff   :  { %1361 = vperm.xlu1 %1729, %v2795_v14   ;;  %v1207_v17 = vpop.xlane.xlu1 %1206  ;;  %v1141_v49 = vpop.xlane.xlu0 %1140 }
 0x300   :  { %1757 = vpow2.f32 %v1268_v26  ;;  %v1236_v16 = vsub.f32 %v3060_v5, %v1207_v17  ;;  %v1214_v61 = vsub.f32 %v3061_v59, %v1141_v49 }
 0x301   :  { %v2801_v58 = vpop.eup %1745  ;;  %1759 = vpow2.f32 %v1266_v24 }
 0x302   :  { %v2803_v45 = vpop.eup %1747  ;;  %v1264_v12 = vmul.f32 1.442695, %v1214_v61  ;;  %1356 = vperm.xlu0 %1730, %v2801_v58   ;;  %1761 = vpow2.f32 %v1312_v2  ;;  %v1308_v50 = vmul.f32 1.442695, %v1236_v16  ;;  %v3066_v16 = vld [vmem:[#allocation48_spill] sm:$0xff] }
 0x303   :  { %1351 = vperm.xlu1 %1729, %v2803_v45   ;;  %v1201_v6 = vpop.xlane.xlu1 %1200  ;;  %v1210_v27 = vpop.xlane.xlu0 %1209 }
 0x304   :  { %v1234_v11 = vsub.f32 %v3062_v18, %v1201_v6  ;;  %v1237_v42 = vsub.f32 %v3063_v0, %v1210_v27  ;;  %1763 = vpow2.f32 %v1264_v12  ;;  %v3067_v12 = vld [vmem:[#allocation45_spill] sm:$0xff] }
 0x305   :  { %v2809_v46 = vpop.eup %1749  ;;  %1765 = vpow2.f32 %v1308_v50 }
 0x306   :  { %v2811_v8 = vpop.eup %1751  ;;  %v1310_v36 = vmul.f32 1.442695, %v1237_v42  ;;  %1346 = vperm.xlu0 %1730, %v2809_v46   ;;  %v1304_v21 = vmul.f32 1.442695, %v1234_v11  ;;  %v3068_v11 = vld [vmem:[#allocation46_spill] sm:$0xff] }
 0x307   :  { %1341 = vperm.xlu1 %1729, %v2811_v8   ;;  %v1195_v1 = vpop.xlane.xlu1 %1194  ;;  %v1204_v25 = vpop.xlane.xlu0 %1203 }
 0x308   :  { %v1232_v34 = vsub.f32 %v3064_v28, %v1195_v1  ;;  %v1235_v7 = vsub.f32 %v3065_v20, %v1204_v25  ;;  %1767 = vpow2.f32 %v1310_v36 }
 0x309   :  { %v2817_v24 = vpop.eup %1753  ;;  %1769 = vpow2.f32 %v1304_v21 }
 0x30a   :  { %v2819_v26 = vpop.eup %1755  ;;  %v1306_v17 = vmul.f32 1.442695, %v1235_v7  ;;  %1336 = vperm.xlu0 %1730, %v2817_v24   ;;  %v1300_v5 = vmul.f32 1.442695, %v1232_v34 }
 0x30b   :  { %1331 = vperm.xlu1 %1729, %v2819_v26   ;;  %v1189_v49 = vpop.xlane.xlu1 %1188  ;;  %v1198_v2 = vpop.xlane.xlu0 %1197 }
 0x30c   :  { %v1233_v59 = vsub.f32 %v3066_v16, %v1198_v2  ;;  %1771 = vpow2.f32 %v1306_v17  ;;  %v1230_v6 = vsub.f32 %v3067_v12, %v1189_v49  ;;  %v3076_v12 = vld [vmem:[#allocation18_spill] sm:$0xff] }
 0x30d   :  { %v2824_v61 = vpop.eup %1757  ;;  %1773 = vpow2.f32 %v1300_v5  ;;  %v3075_v5 = vld [vmem:[#allocation19_spill] sm:$0xff] }
 0x30e   :  { %v2827_v27 = vpop.eup %1759  ;;  %v1302_v50 = vmul.f32 1.442695, %v1233_v59  ;;  %1326 = vperm.xlu0 %1730, %v2824_v61   ;;  %v1296_v36 = vmul.f32 1.442695, %v1230_v6  ;;  %v390_v16 = vmax.f32 %v3075_v5, 0.0  ;;  %v388_v6 = vmax.f32 %v3076_v12, 0.0 }
 0x30f   :  { %1321 = vperm.xlu1 %1729, %v2827_v27   ;;  %v1192_v18 = vpop.xlane.xlu0 %1191  ;;  %v2832_v42 = vpop.eup %1761  ;;  %v3089_v12 = vld [vmem:[#allocation30_spill] sm:$0xff] }
 0x310   :  { %v1231_v0 = vsub.f32 %v3068_v11, %v1192_v18  ;;  %1775 = vpow2.f32 %v1302_v50  ;;  %v3077_v50 = vld [vmem:[#allocation17_spill] sm:$0xff] }
 0x311   :  { %v2834_v1 = vpop.eup %1763  ;;  %v386_v18 = vmax.f32 %v3077_v50, 0.0 }
 0x312   :  { %v1298_v25 = vmul.f32 1.442695, %v1231_v0  ;;  %1316 = vperm.xlu0 %1730, %v2834_v1   ;;  %v2838_v21 = vpop.eup %1765  ;;  %v3078_v0 = vld [vmem:[#allocation16_spill] sm:$0xff] }
 0x313   :  { %1436 = vperm.xlu1 %1729, %v2832_v42  }
 0x314   :  { %1777 = vpow2.f32 %v1298_v25 }
 0x315   :  { %1779 = vpow2.f32 %v1296_v36  ;;  %v2840_v28 = vpop.eup %1767  ;;  %v384_v36 = vmax.f32 %v3078_v0, 0.0 }
 0x316   :  { %1431 = vperm.xlu0 %1730, %v2840_v28   ;;  %v2844_v34 = vpop.eup %1769 }
 0x317   :  { %1426 = vperm.xlu1 %1729, %v2838_v21  }
 0x319   :  { %v2846_v20 = vpop.eup %1771 }
 0x31a   :  { %1421 = vperm.xlu0 %1730, %v2846_v20   ;;  %v2850_v7 = vpop.eup %1773 }
 0x31b   :  { %1416 = vperm.xlu1 %1729, %v2844_v34  }
 0x31d   :  { %v2852_v17 = vpop.eup %1775 }
 0x31e   :  { %1411 = vperm.xlu0 %1730, %v2852_v17  }
 0x31f   :  { %1406 = vperm.xlu1 %1729, %v2850_v7  }
 0x321   :  { %v2856_v49 = vpop.eup %1777 }
 0x322   :  { %v2858_v2 = vpop.eup %1779  ;;  %1401 = vperm.xlu0 %1730, %v2856_v49  }
 0x323   :  { %1396 = vperm.xlu1 %1729, %v2858_v2  }
 0x340   :  { %1521 = vxpose.xlu0.b32.start [1/9] (short) (narrow) %v2740_v47, 8  ;;  %v1074_v47 = vmul.f32 1.442695, %v1073_v32 }
 0x342   :  { %1781 = vpow2.f32 %v1074_v47 }
 0x344   :  { %1522 = vxpose.xlu0.b32.cont [2/9] (short) (narrow) %v2758_v43, 8 }
 0x348   :  { %1523 = vxpose.xlu0.b32.cont [3/9] (short) (narrow) %v2722_v56, 8 }
 0x34c   :  { %1489 = vxpose.xlu1.b32.start [1/16] (narrow) %v2686_v10, 8  ;;  %1524 = vxpose.xlu0.b32.cont [4/9] (short) (narrow) %v2746_v54, 8  ;;  %v3074_v54 = vld [vmem:[#allocation20_spill] sm:$0xff] }
 0x34d   :  { %v392_v43 = vmax.f32 %v3074_v54, 0.0 }
 0x34f   :  { %v1782_v48 = vpop.eup %1781 }
 0x350   :  { %1490 = vxpose.xlu1.b32.cont [2/16] (narrow) %v2650_v37, 8  ;;  %1525 = vxpose.xlu0.b32.cont [5/9] (short) (narrow) %v2710_v63, 8  ;;  %v3073_v63 = vld [vmem:[#allocation21_spill] sm:$0xff] }
 0x351   :  { %v394_v56 = vmax.f32 %v3073_v63, 0.0 }
 0x354   :  { %1491 = vxpose.xlu1.b32.cont [3/16] (narrow) %v2674_v62, 8  ;;  %1526 = vxpose.xlu0.b32.cont [6/9] (short) (narrow) %v2728_v51, 8 }
 0x358   :  { %1492 = vxpose.xlu1.b32.cont [4/16] (narrow) %v2632_v52, 8  ;;  %1527 = vxpose.xlu0.b32.cont [7/9] (short) (narrow) %v2692_v23, 8  ;;  %v3070_v52 = vld [vmem:[#allocation24_spill] sm:$0xff]  ;;  %v3072_v23 = vld [vmem:[#allocation22_spill] sm:$0xff] }
 0x359   :  { %v400_v37 = vmax.f32 %v3070_v52, 0.0 }
 0x35c   :  { %1493 = vxpose.xlu1.b32.cont [5/16] (narrow) %v2656_v15, 8  ;;  %1528 = vxpose.xlu0.b32.cont [8/9] (short) (narrow) %v2704_v53, 8 }
 0x360   :  { %1494 = vxpose.xlu1.b32.cont [6/16] (narrow) %v2614_v29, 8  ;;  %1529 = vxpose.xlu0.b32.end [9/9] (short) (narrow) %v2668_v9, 8  ;;  %v3071_v29 = vld [vmem:[#allocation23_spill] sm:$0xff] }
 0x361   :  { %v398_v9 = vmax.f32 %v3071_v29, 0.0  ;;  %v3083_v29 = vld [vmem:[#allocation11_spill] sm:$0xff] }
 0x364   :  { %1495 = vxpose.xlu1.b32.cont [7/16] (narrow) %v2638_v22, 8  ;;  %1076 = vxpose.xlu0.b32.start.end [1/1] (short) (narrow) %v1782_v48, 8 }
 0x368   :  { %1496 = vxpose.xlu1.b32.cont [8/16] (narrow) %v2596_v30, 8 }
 0x36c   :  { %1497 = vxpose.xlu1.b32.cont [9/16] (narrow) %v2620_v31, 8  ;;  %v396_v31 = vmax.f32 %v3072_v23, 0.0 }
 0x36d   :  { %v1392_v32 = vpop.permute.xlu0 %1391 }
 0x36e   :  { %v1387_v15 = vpop.permute.xlu1 %1386  ;;  %v1454_v62 = vmul.f32 %v1392_v32, %v402_v41  ;;  %v380_v41 = vmax.f32 %v3080_v4, 0.0 }
 0x36f   :  { %v1453_v10 = vmul.f32 %v1387_v15, %v400_v37  ;;  %v3082_v15 = vld [vmem:[#allocation12_spill] sm:$0xff] }
 0x370   :  { %1498 = vxpose.xlu1.b32.cont [10/16] (narrow) %v2578_v33, 8  ;;  %1558 = vmatpush1.msra.mxu1 %v1454_v62  ;;  %v376_v62 = vmax.f32 %v3082_v15, 0.0 }
 0x371   :  { %1559 = vmatprep.subr.mxu1 %v2775_v57 }
 0x372   :  { %v1382_v22 = vpop.permute.xlu1 %1381  ;;  %1560 = vmatpush1.msra.mxu1 %v1453_v10  ;;  %v368_v10 = vpop.f32.mrf.mxu0 }
 0x373   :  { %v1452_v30 = vmul.f32 %v1382_v22, %v398_v9  ;;  %1561 = vmatprep.subr.mxu1 %v2779_v60 }
 0x374   :  { %1499 = vxpose.xlu1.b32.cont [11/16] (narrow) %v2602_v35, 8 }
 0x375   :  { %1562 = vmatpush1.msra.mxu1 %v1452_v30  ;;  %v1377_v53 = vpop.permute.xlu0 %1376  ;;  %v3084_v30 = vld [vmem:[#allocation9_spill] sm:$0xff] }
 0x376   :  { %v1372_v51 = vpop.permute.xlu1 %1371  ;;  %1563 = vmatprep.subr.mxu1 %v2784_v55  ;;  %v1451_v33 = vmul.f32 %v1377_v53, %v396_v31  ;;  %v369_v23 = vadd.f32 %v368_v10, %v3084_v30  ;;  %v3085_v31 = vld [vmem:[#allocation10_spill] sm:$0xff] }
 0x377   :  { %v1450_v57 = vmul.f32 %v1372_v51, %v394_v56  ;;  %v372_v53 = vmax.f32 %v3085_v31, 0.0  ;;  %v3086_v51 = vld [vmem:[#allocation33_spill] sm:$0xff] }
 0x378   :  { %1500 = vxpose.xlu1.b32.cont [12/16] (narrow) %v2560_v19, 8  ;;  %1564 = vmatpush1.msra.mxu1 %v1451_v33  ;;  %v418_v33 = vmax.f32 %v3086_v51, 0.0 }
 0x379   :  { %1565 = vmatprep.subr.mxu1 %v2787_v3  ;;  %v1367_v60 = vpop.permute.xlu0 %1366 }
 0x37a   :  { %v1362_v35 = vpop.permute.xlu1 %1361  ;;  %v1449_v59 = vmul.f32 %v1367_v60, %v392_v43  ;;  %1566 = vmatpush1.msra.mxu1 %v1450_v57  ;;  %v3087_v57 = vld [vmem:[#allocation32_spill] sm:$0xff] }
 0x37b   :  { %1567 = vmatprep.subr.mxu1 %v2793_v44  ;;  %v1448_v55 = vmul.f32 %v1362_v35, %v390_v16  ;;  %v3079_v44 = vld [vmem:[#allocation15_spill] sm:$0xff]  ;;  %v416_v60 = vmax.f32 %v3087_v57, 0.0 }
 0x37c   :  { %1501 = vxpose.xlu1.b32.cont [13/16] (narrow) %v2584_v39, 8  ;;  %1568 = vmatpush1.msra.mxu1 %v1449_v59  ;;  %v382_v47 = vmax.f32 %v3079_v44, 0.0  ;;  %v3093_v44 = vld [vmem:[#allocation26_spill] sm:$0xff] }
 0x37d   :  { %1569 = vmatprep.subr.mxu1 %v2795_v14  ;;  %v1357_v19 = vpop.permute.xlu0 %1356 }
 0x37e   :  { %v1352_v3 = vpop.permute.xlu1 %1351  ;;  %v1447_v11 = vmul.f32 %v1357_v19, %v388_v6  ;;  %1570 = vmatpush1.msra.mxu1 %v1448_v55  ;;  %v412_v6 = vmax.f32 %v3089_v12, 0.0 }
 0x37f   :  { %1571 = vmatprep.subr.mxu1 %v2801_v58  ;;  %v1446_v25 = vmul.f32 %v1352_v3, %v386_v18  ;;  %v3081_v58 = vld [vmem:[#allocation13_spill] sm:$0xff]  ;;  %v3091_v3 = vld [vmem:[#allocation28_spill] sm:$0xff] }
 0x380   :  { %1502 = vxpose.xlu1.b32.cont [14/16] (narrow) %v2566_v40, 8  ;;  %1572 = vmatpush1.msra.mxu1 %v1447_v11  ;;  %v378_v52 = vmax.f32 %v3081_v58, 0.0  ;;  %v408_v11 = vmax.f32 %v3091_v3, 0.0 }
 0x381   :  { %1573 = vmatprep.subr.mxu1 %v2803_v45  ;;  %v1347_v39 = vpop.permute.xlu0 %1346 }
 0x382   :  { %v1342_v14 = vpop.permute.xlu1 %1341  ;;  %v1445_v48 = vmul.f32 %v1347_v39, %v384_v36  ;;  %1574 = vmatpush1.msra.mxu1 %v1446_v25 }
 0x383   :  { %1575 = vmatprep.subr.mxu1 %v2809_v46  ;;  %v1444_v32 = vmul.f32 %v1342_v14, %v382_v47  ;;  %v404_v47 = vmax.f32 %v3093_v44, 0.0 }
 0x384   :  { %1503 = vxpose.xlu1.b32.cont [15/16] (narrow) %v2544_v38, 8  ;;  %1576 = vmatpush1.msra.mxu1 %v1445_v48 }
 0x385   :  { %1577 = vmatprep.subr.mxu1 %v2811_v8  ;;  %v1337_v40 = vpop.permute.xlu0 %1336  ;;  %v374_v8 = vmax.f32 %v3083_v29, 0.0 }
 0x386   :  { %v1332_v45 = vpop.permute.xlu1 %1331  ;;  %v1443_v37 = vmul.f32 %v1337_v40, %v380_v41  ;;  %1578 = vmatpush1.msra.mxu1 %v1444_v32 }
 0x387   :  { %1579 = vmatprep.subr.mxu1 %v2817_v24  ;;  %v1442_v46 = vmul.f32 %v1332_v45, %v378_v52 }
 0x388   :  { %1504 = vxpose.xlu1.b32.end [16/16] (narrow) %v2550_v13, 8  ;;  %1580 = vmatpush1.msra.mxu1 %v1443_v37 }
 0x389   :  { %1581 = vmatprep.subr.mxu1 %v2819_v26  ;;  %v1327_v38 = vpop.permute.xlu0 %1326  ;;  %v420_v26 = vmax.f32 %v369_v23, 0.0 }
 0x38a   :  { %v1322_v9 = vpop.permute.xlu1 %1321  ;;  %v1441_v22 = vmul.f32 %v1327_v38, %v376_v62  ;;  %1582 = vmatpush1.msra.mxu1 %v1442_v46 }
 0x38b   :  { %1583 = vmatprep.subr.mxu1 %v2824_v61  ;;  %v1440_v24 = vmul.f32 %v1322_v9, %v374_v8 }
 0x38c   :  { %1584 = vmatpush1.msra.mxu1 %v1441_v22 }
 0x38d   :  { %1585 = vmatprep.subr.mxu1 %v2827_v27  ;;  %v1317_v63 = vpop.permute.xlu0 %1316  ;;  %v3088_v27 = vld [vmem:[#allocation31_spill] sm:$0xff] }
 0x38e   :  { %v1437_v13 = vpop.permute.xlu1 %1436  ;;  %1586 = vmatpush1.msra.mxu1 %v1440_v24  ;;  %v1439_v56 = vmul.f32 %v1317_v63, %v372_v53  ;;  %v414_v16 = vmax.f32 %v3088_v27, 0.0 }
 0x38f   :  { %1587 = vmatprep.subr.mxu1 %v2834_v1  ;;  %v1463_v54 = vmul.f32 %v1437_v13, %v420_v26 }
 0x390   :  { %1588 = vmatpush1.msra.mxu1 %v1439_v56 }
 0x391   :  { %1603 = vmatprep.subr.mxu1 %v2832_v42  ;;  %v1432_v61 = vpop.permute.xlu0 %1431  ;;  %v3090_v42 = vld [vmem:[#allocation29_spill] sm:$0xff] }
 0x392   :  { %v1427_v43 = vpop.permute.xlu1 %1426  ;;  %v1462_v5 = vmul.f32 %v1432_v61, %v418_v33  ;;  %1604 = vmatpush2.msra.mxu1 %v1463_v54  ;;  %v410_v19 = vmax.f32 %v3090_v42, 0.0 }
 0x393   :  { %1605 = vmatprep.subr.mxu1 %v2840_v28  ;;  %v1461_v35 = vmul.f32 %v1427_v43, %v416_v60 }
 0x394   :  { %1606 = vmatpush2.msra.mxu1 %v1462_v5 }
 0x395   :  { %1607 = vmatprep.subr.mxu1 %v2838_v21  ;;  %v1422_v1 = vpop.permute.xlu0 %1421  ;;  %v3092_v21 = vld [vmem:[#allocation27_spill] sm:$0xff] }
 0x396   :  { %v1417_v59 = vpop.permute.xlu1 %1416  ;;  %v1460_v55 = vmul.f32 %v1422_v1, %v414_v16  ;;  %1608 = vmatpush2.msra.mxu1 %v1461_v35  ;;  %v406_v36 = vmax.f32 %v3092_v21, 0.0 }
 0x397   :  { %1609 = vmatprep.subr.mxu1 %v2846_v20  ;;  %v1459_v50 = vmul.f32 %v1417_v59, %v412_v6 }
 0x398   :  { %1610 = vmatpush2.msra.mxu1 %v1460_v55 }
 0x399   :  { %1611 = vmatprep.subr.mxu1 %v2844_v34  ;;  %v1412_v28 = vpop.permute.xlu0 %1411 }
 0x39a   :  { %v1407_v18 = vpop.permute.xlu1 %1406  ;;  %v1458_v0 = vmul.f32 %v1412_v28, %v410_v19  ;;  %1612 = vmatpush2.msra.mxu1 %v1459_v50 }
 0x39b   :  { %1613 = vmatprep.subr.mxu1 %v2852_v17  ;;  %v1457_v25 = vmul.f32 %v1407_v18, %v408_v11 }
 0x39c   :  { %1614 = vmatpush2.msra.mxu1 %v1458_v0 }
 0x39d   :  { %1615 = vmatprep.subr.mxu1 %v2850_v7  ;;  %v1402_v20 = vpop.permute.xlu0 %1401  ;;  %v1637_v7 = vld [vmem:[#allocation3] sm:$0xff] }
 0x39e   :  { %v1397_v39 = vpop.permute.xlu1 %1396  ;;  %v1456_v14 = vmul.f32 %v1402_v20, %v406_v36  ;;  %1616 = vmatpush2.msra.mxu1 %v1457_v25 }
 0x39f   :  { %1617 = vmatprep.subr.mxu1 %v2856_v49  ;;  %v1455_v34 = vmul.f32 %v1397_v39, %v404_v47 }
 0x3a0   :  { %1618 = vmatpush2.msra.mxu1 %v1456_v14 }
 0x3a1   :  { %1619 = vmatprep.subr.mxu1 %v2858_v2 }
 0x3a2   :  { %1620 = vmatpush2.msra.mxu1 %v1455_v34 }
 0x3bc   :  { %v1537_v17 = vpop.trf.xlu0 }
 0x3bd   :  { %1724 = vmatprep.mubr.msk.f32.mxu1 %vm1553_vm6, %v1537_v17 }
 0x3c8   :  { %v1505_v48 = vpop.trf.xlu1 }
 0x3c9   :  { %1622 = vmatmul.mubr.f32.vlgmr.msra.gmra.mxu1 %v1505_v48 }
 0x3e0   :  { %v1092_v4 = vpop.trf.xlu0 }
 0x3e1   :  { %1631 = vperm.xlu1 %1729, %v1092_v4   ;;  %v1638_v41 = vmul.f32 %v1637_v7, %v1092_v4 }
 0x45c   :  { %v1632_v2 = vpop.permute.xlu1 %1631 }
 0x45d   :  { %v1634_v37 = vmul.f32 0.0, %v1632_v2 }
 0x489   :  { %v1623_v32 = vpop.f32.mrf.mxu1 }
 0x48a   :  { %v1635_v15 = vadd.f32 %v1634_v37, %v1623_v32 }
 0x48b   :  { %v1625_v40 = vpop.f32.mrf.mxu1 }
 0x48c   :  { %v1639_v58 = vadd.f32 %v1638_v41, %v1625_v40 }
 0x48e   :  { %1641 = vst.msk [vmem:[#allocation3] sm:$0xff] %vm32_vm5, %v1639_v58 }
 0x495   :  { %v1647_v49 = vld [vmem:[#allocation3] sm:$0xff] }
 0x496   :  { %v1648_v52 = vadd.f32 1e-16, %v1647_v49 }
 0x498   :  { %1652 = vperm.xlu0 %1730, %v1648_v52  }
 0x513   :  { %v1653_v45 = vpop.permute.xlu0 %1652 }
 0x514   :  { %1783 = vrcp.f32 %v1653_v45 }
 0x521   :  { %v1784_v62 = vpop.eup %1783 }
 0x522   :  { %v1656_v10 = vmul.f32 %v1784_v62, %v1635_v15 }
 0x524   :  { %1657 = vst [vmem:[#allocation6] sm:$0xff] %v1656_v10 }
 0x525   :  { %1796 = shalt.err (!%p1793_p4)
}
 0x526   :  { %1667 = dma.vmem_to_hbm [thread:$0]  %s1665_s11, 128, %s2951_s6, [#allocation7]  }
 0x527   :  { %1805 = dma.done.wait [#allocation7], 128  }
 0x528   :  { %1806 = vsyncadd [#allocation7], 4294967168 }
 0x529   :  { %1671 = vsyncpa [#allocation7], 1 }

</bundles_post_ra>
